<compile_context>
chip_gen: v6e
topology: v6e:2x2x1
jax: 0.10.0
libtpu: 0.0.40
codegen_flags: <defaults>
</compile_context>

<pallas_src>
import functools

import jax
import jax.numpy as jnp
from jax.experimental import pallas as pl
from jax.experimental.pallas import tpu as pltpu

EPS = 1e-10  # LayerNormalization epsilon from the PyTorch module


# ---------------------------------------------------------------------------
# Pallas kernel: the FULL encoder (all layers) for a block of folded rows
# (rows = batch*seq).  Per-layer parameters are stacked along a leading axis.
# ---------------------------------------------------------------------------
def encoder_kernel(x_ref,
                   wqkv_ref, bqkv_ref,
                   wpj_ref, bpj_ref,
                   ln1_s_ref, ln1_b_ref,
                   w1_ref, b1_ref, w2_ref, b2_ref,
                   ln2_s_ref, ln2_b_ref,
                   out_ref, *, num_heads, num_layers, seq_len):
    x = x_ref[...]                                 # (R, M), R = nb * K folded rows
    R, M = x.shape
    K = seq_len
    nb = R // K                                    # batch elements in this block
    H = num_heads
    dh = M // H
    scale = 1.0 / (dh ** 0.5)                      # 1/sqrt(dim_q), dim_q = M // H

    def layer_norm(z, s, b):
        m = jnp.mean(z, axis=-1, keepdims=True)
        c = z - m
        std = jnp.sqrt(jnp.mean(c * c, axis=-1, keepdims=True))  # unbiased=False
        # Faithful to the PyTorch module: divide by (std + eps), not sqrt(var+eps).
        return s * c * pl.reciprocal(std + EPS, approx=False) + b

    for layer in range(num_layers):                # static unroll: layers fused
        # --- fused QKV projection on folded rows: one MXU matmul + bias ------
        qkv = jnp.dot(x, wqkv_ref[layer],
                      preferred_element_type=jnp.float32) + bqkv_ref[layer]

        # --- heads+batch batched attention -----------------------------------
        # build (H*nb, K, dh) stacks; scores / weighted sums are single batched
        # contractions and softmax runs ONCE over the (H*nb, K, K) tensor.
        def split_heads(off):
            parts = [qkv[:, off + h * dh: off + (h + 1) * dh] for h in range(H)]
            return jnp.stack(parts, axis=0).reshape(H * nb, K, dh)

        q3 = split_heads(0)
        k3 = split_heads(M)
        v3 = split_heads(2 * M)

        s = jnp.einsum('bqd,bkd->bqk', q3, k3,
                       preferred_element_type=jnp.float32) * scale
        s = s - jnp.max(s, axis=-1, keepdims=True)          # stable softmax
        p = jnp.exp(s)
        p = p * pl.reciprocal(jnp.sum(p, axis=-1, keepdims=True), approx=False)
        o3 = jnp.einsum('bqk,bkd->bqd', p, v3,
                        preferred_element_type=jnp.float32)  # (H*nb, K, dh)

        # concat heads (single pass) + output projection (linear_pj)
        o3 = o3.reshape(H, R, dh)
        att = jnp.concatenate([o3[h] for h in range(H)], axis=-1)   # (R, M)
        att = jnp.dot(att, wpj_ref[layer],
                      preferred_element_type=jnp.float32) + bpj_ref[layer]

        # --- residual + LayerNorm 1 ------------------------------------------
        n1 = layer_norm(x + att, ln1_s_ref[layer], ln1_b_ref[layer])
        # dropout: identity in eval mode

        # --- feed-forward block ------------------------------------------------
        h1 = jnp.maximum(
            jnp.dot(n1, w1_ref[layer],
                    preferred_element_type=jnp.float32) + b1_ref[layer], 0.0)
        ff = jnp.dot(h1, w2_ref[layer],
                     preferred_element_type=jnp.float32) + b2_ref[layer]

        # --- residual + LayerNorm 2 ------------------------------------------
        x = layer_norm(n1 + ff, ln2_s_ref[layer], ln2_b_ref[layer])
        # dropout: identity in eval mode

    out_ref[...] = x.astype(out_ref.dtype)


# ---------------------------------------------------------------------------
# Wrapper: the whole Encoder in ONE pallas_call.  v5e/v6e (1 TC): a single
# grid step processing the whole folded batch.  v7x (2 TCs): two "parallel"
# grid steps, each with half the batch.
# ---------------------------------------------------------------------------
def _default_num_steps(batch):
    try:
        kind = jax.devices()[0].device_kind.lower()
    except Exception:
        kind = ""
    two_tc = "v7" in kind            # v7x has 2 TensorCores per chip
    if two_tc and batch >= 2 and batch % 2 == 0:
        return 2
    return 1


def encoder_pallas(x, stacked, num_heads, num_steps=None):
    N, K, M = x.shape
    num_layers = stacked["wqkv"].shape[0]

    if num_steps is None:
        num_steps = _default_num_steps(N)
    if N % num_steps != 0:
        num_steps = 1
    rows_per_step = (N // num_steps) * K

    names = ["wqkv", "bqkv", "wpj", "bpj", "ln1_s", "ln1_b",
             "w1", "b1", "w2", "b2", "ln2_s", "ln2_b"]
    args = [stacked[nm] for nm in names]

    # every (layer-stacked) parameter is one full-sized resident VMEM block
    param_specs = [pl.BlockSpec(a.shape, lambda i, _r=a.ndim: (0,) * _r)
                   for a in args]

    # fold (N, K, M) -> (N*K, M): lane-contiguous 2-D slabs in and out
    x2 = x.reshape(N * K, M)

    out2 = pl.pallas_call(
        functools.partial(encoder_kernel, num_heads=num_heads,
                          num_layers=num_layers, seq_len=K),
        out_shape=jax.ShapeDtypeStruct((N * K, M), x.dtype),
        grid=(num_steps,),
        in_specs=[pl.BlockSpec((rows_per_step, M), lambda i: (i, 0))] + param_specs,
        out_specs=pl.BlockSpec((rows_per_step, M), lambda i: (i, 0)),
        compiler_params=pltpu.CompilerParams(dimension_semantics=("parallel",)),
    )(x2, *args)

    return out2.reshape(N, K, M)


# ---------------------------------------------------------------------------
# Pure-JAX reference (mirrors the PyTorch forward exactly) for verification.
# ---------------------------------------------------------------------------
def encoder_block_ref(x, p, num_heads):
    N, K, M = x.shape
    dh = M // num_heads
    qkv = x @ p["wqkv"] + p["bqkv"]
    q, k, v = qkv[..., :M], qkv[..., M:2 * M], qkv[..., 2 * M:]
    outs = []
    for h in range(num_heads):
        qh, kh, vh = (t[..., h * dh:(h + 1) * dh] for t in (q, k, v))
        s = jnp.einsum("nqd,nkd->nqk", qh, kh) / (dh ** 0.5)
        w = jax.nn.softmax(s, axis=-1)
        outs.append(jnp.einsum("nqk,nkd->nqd", w, vh))
    att = jnp.concatenate(outs, axis=-1) @ p["wpj"] + p["bpj"]

    def ln(z, s_, b_):
        m = jnp.mean(z, axis=-1, keepdims=True)
        sd = jnp.sqrt(jnp.mean((z - m) ** 2, axis=-1, keepdims=True))
        return s_ * (z - m) / (sd + EPS) + b_

    n1 = ln(x + att, p["ln1_s"], p["ln1_b"])
    ff = jnp.maximum(n1 @ p["w1"] + p["b1"], 0.0) @ p["w2"] + p["b2"]
    return ln(n1 + ff, p["ln2_s"], p["ln2_b"])


def encoder_ref(x, layer_params, num_heads):
    for p in layer_params:
        x = encoder_block_ref(x, p, num_heads)
    return x


# ---------------------------------------------------------------------------
# Deterministic parameter construction (synthetic; shapes follow __init__).
# Per-head Wq/Wk/Wv are stacked along the output dim and fused into one
# (M, 3M) QKV weight (stored (in, out)).
# ---------------------------------------------------------------------------
def make_layer_params(key, emb_dim, feedforward_dim):
    ks = jax.random.split(key, 8)
    u = lambda k, shape, b=0.3: jax.random.uniform(k, shape, jnp.float32, -b, b)
    return {
        "wqkv": u(ks[0], (emb_dim, 3 * emb_dim)),
        "bqkv": u(ks[1], (1, 3 * emb_dim)),
        "wpj": u(ks[2], (emb_dim, emb_dim)),
        "bpj": u(ks[3], (1, emb_dim)),
        "ln1_s": jnp.ones((1, emb_dim), jnp.float32),
        "ln1_b": jnp.zeros((1, emb_dim), jnp.float32),
        "w1": u(ks[4], (emb_dim, feedforward_dim)),
        "b1": u(ks[5], (1, feedforward_dim)),
        "w2": u(ks[6], (feedforward_dim, emb_dim)),
        "b2": u(ks[7], (1, emb_dim)),
        "ln2_s": jnp.ones((1, emb_dim), jnp.float32),
        "ln2_b": jnp.zeros((1, emb_dim), jnp.float32),
    }


def stack_params(layer_params):
    return {k: jnp.stack([p[k] for p in layer_params], axis=0)
            for k in layer_params[0]}


if __name__ == "__main__":
    # Encoder(num_heads=4, emb_dim=32, feedforward_dim=64, num_layers=2, dropout=0.1)
    num_heads, emb_dim, feedforward_dim, num_layers = 4, 32, 64, 2
    N, K = 2, 8  # batch, sequence length

    root = jax.random.PRNGKey(0)
    k_x, *k_layers = jax.random.split(root, 1 + num_layers)
    src_seq = jax.random.normal(k_x, (N, K, emb_dim), jnp.float32)
    layer_params = [make_layer_params(k, emb_dim, feedforward_dim) for k in k_layers]
    stacked = stack_params(layer_params)

    out = encoder_pallas(src_seq, stacked, num_heads)
    out = jax.block_until_ready(out)

    ref = encoder_ref(src_seq, layer_params, num_heads)
    assert out.shape == (N, K, emb_dim)
    assert jnp.allclose(out, ref, atol=1e-4, rtol=1e-4), "mismatch vs pure-JAX reference"

    # TODO(synk): dropout is implemented as identity (eval-mode semantics);
    # stochastic training-mode dropout would need pltpu.prng_* inside the kernel.
    print("KERNEL_OK")
</pallas_src>

<mosaic_0001>
module attributes {stable_mosaic.version = 11 : i64} {
  func.func @encoder_kernel(%arg0: i32, %arg1: memref<16x32xf32, #tpu.memory_space<vmem>>, %arg2: memref<2x32x96xf32, #tpu.memory_space<vmem>>, %arg3: memref<2x1x96xf32, #tpu.memory_space<vmem>>, %arg4: memref<2x32x32xf32, #tpu.memory_space<vmem>>, %arg5: memref<2x1x32xf32, #tpu.memory_space<vmem>>, %arg6: memref<2x1x32xf32, #tpu.memory_space<vmem>>, %arg7: memref<2x1x32xf32, #tpu.memory_space<vmem>>, %arg8: memref<2x32x64xf32, #tpu.memory_space<vmem>>, %arg9: memref<2x1x64xf32, #tpu.memory_space<vmem>>, %arg10: memref<2x64x32xf32, #tpu.memory_space<vmem>>, %arg11: memref<2x1x32xf32, #tpu.memory_space<vmem>>, %arg12: memref<2x1x32xf32, #tpu.memory_space<vmem>>, %arg13: memref<2x1x32xf32, #tpu.memory_space<vmem>>, %arg14: memref<16x32xf32, #tpu.memory_space<vmem>>) attributes {dimension_semantics = [#tpu.dimension_semantics<parallel>], iteration_bounds = array<i64: 1>, scalar_prefetch = 0 : i64, scratch_operands = 0 : i64, tpu.core_type = #tpu.core_type<tc>, window_params = [{transform_indices = @transform_0, window_bounds = array<i64: 16, 32>}, {pipeline_mode = #tpu.pipeline_mode<synchronous>, transform_indices = @transform_1, window_bounds = array<i64: 2, 32, 96>}, {pipeline_mode = #tpu.pipeline_mode<synchronous>, transform_indices = @transform_2, window_bounds = array<i64: 2, 1, 96>}, {pipeline_mode = #tpu.pipeline_mode<synchronous>, transform_indices = @transform_3, window_bounds = array<i64: 2, 32, 32>}, {pipeline_mode = #tpu.pipeline_mode<synchronous>, transform_indices = @transform_4, window_bounds = array<i64: 2, 1, 32>}, {pipeline_mode = #tpu.pipeline_mode<synchronous>, transform_indices = @transform_5, window_bounds = array<i64: 2, 1, 32>}, {pipeline_mode = #tpu.pipeline_mode<synchronous>, transform_indices = @transform_6, window_bounds = array<i64: 2, 1, 32>}, {pipeline_mode = #tpu.pipeline_mode<synchronous>, transform_indices = @transform_7, window_bounds = array<i64: 2, 32, 64>}, {pipeline_mode = #tpu.pipeline_mode<synchronous>, transform_indices = @transform_8, window_bounds = array<i64: 2, 1, 64>}, {pipeline_mode = #tpu.pipeline_mode<synchronous>, transform_indices = @transform_9, window_bounds = array<i64: 2, 64, 32>}, {pipeline_mode = #tpu.pipeline_mode<synchronous>, transform_indices = @transform_10, window_bounds = array<i64: 2, 1, 32>}, {pipeline_mode = #tpu.pipeline_mode<synchronous>, transform_indices = @transform_11, window_bounds = array<i64: 2, 1, 32>}, {pipeline_mode = #tpu.pipeline_mode<synchronous>, transform_indices = @transform_12, window_bounds = array<i64: 2, 1, 32>}, {transform_indices = @transform_13, window_bounds = array<i64: 16, 32>}]} {
    %c0 = arith.constant 0 : index
    %c0_0 = arith.constant 0 : index
    %0 = vector.load %arg1[%c0, %c0_0] : memref<16x32xf32, #tpu.memory_space<vmem>>, vector<16x32xf32>
    %c0_1 = arith.constant 0 : index
    %c0_2 = arith.constant 0 : index
    %c0_3 = arith.constant 0 : index
    %1 = vector.load %arg2[%c0_1, %c0_2, %c0_3] : memref<2x32x96xf32, #tpu.memory_space<vmem>>, vector<1x32x96xf32>
    %2 = vector.shape_cast %1 : vector<1x32x96xf32> to vector<32x96xf32>
    %cst = arith.constant dense<0.000000e+00> : vector<16x96xf32>
    %3 = tpu.matmul %0, %2, %cst {dimension_numbers = #tpu.dot_dimension_numbers<[1], [0], [0], [1], [0, 0, 1, 1], [], []>} : vector<16x32xf32>, vector<32x96xf32>, vector<16x96xf32> -> vector<16x96xf32>
    %c0_4 = arith.constant 0 : index
    %c0_5 = arith.constant 0 : index
    %c0_6 = arith.constant 0 : index
    %4 = vector.load %arg3[%c0_4, %c0_5, %c0_6] : memref<2x1x96xf32, #tpu.memory_space<vmem>>, vector<1x1x96xf32>
    %5 = vector.shape_cast %4 : vector<1x1x96xf32> to vector<1x96xf32>
    %6 = vector.broadcast %5 : vector<1x96xf32> to vector<16x96xf32>
    %7 = arith.addf %3, %6 : vector<16x96xf32>
    %8 = vector.extract_strided_slice %7 {offsets = [0, 0], sizes = [16, 8], strides = [1, 1]} : vector<16x96xf32> to vector<16x8xf32>
    %9 = vector.extract_strided_slice %7 {offsets = [0, 8], sizes = [16, 8], strides = [1, 1]} : vector<16x96xf32> to vector<16x8xf32>
    %10 = vector.extract_strided_slice %7 {offsets = [0, 16], sizes = [16, 8], strides = [1, 1]} : vector<16x96xf32> to vector<16x8xf32>
    %11 = vector.extract_strided_slice %7 {offsets = [0, 24], sizes = [16, 8], strides = [1, 1]} : vector<16x96xf32> to vector<16x8xf32>
    %12 = vector.shape_cast %8 : vector<16x8xf32> to vector<1x16x8xf32>
    %13 = vector.shape_cast %9 : vector<16x8xf32> to vector<1x16x8xf32>
    %14 = vector.shape_cast %10 : vector<16x8xf32> to vector<1x16x8xf32>
    %15 = vector.shape_cast %11 : vector<16x8xf32> to vector<1x16x8xf32>
    %16 = tpu.concatenate %12, %13, %14, %15 in 0 : vector<1x16x8xf32>, vector<1x16x8xf32>, vector<1x16x8xf32>, vector<1x16x8xf32> -> vector<4x16x8xf32>
    %17 = vector.shape_cast %16 : vector<4x16x8xf32> to vector<8x8x8xf32>
    %18 = vector.extract_strided_slice %7 {offsets = [0, 32], sizes = [16, 8], strides = [1, 1]} : vector<16x96xf32> to vector<16x8xf32>
    %19 = vector.extract_strided_slice %7 {offsets = [0, 40], sizes = [16, 8], strides = [1, 1]} : vector<16x96xf32> to vector<16x8xf32>
    %20 = vector.extract_strided_slice %7 {offsets = [0, 48], sizes = [16, 8], strides = [1, 1]} : vector<16x96xf32> to vector<16x8xf32>
    %21 = vector.extract_strided_slice %7 {offsets = [0, 56], sizes = [16, 8], strides = [1, 1]} : vector<16x96xf32> to vector<16x8xf32>
    %22 = vector.shape_cast %18 : vector<16x8xf32> to vector<1x16x8xf32>
    %23 = vector.shape_cast %19 : vector<16x8xf32> to vector<1x16x8xf32>
    %24 = vector.shape_cast %20 : vector<16x8xf32> to vector<1x16x8xf32>
    %25 = vector.shape_cast %21 : vector<16x8xf32> to vector<1x16x8xf32>
    %26 = tpu.concatenate %22, %23, %24, %25 in 0 : vector<1x16x8xf32>, vector<1x16x8xf32>, vector<1x16x8xf32>, vector<1x16x8xf32> -> vector<4x16x8xf32>
    %27 = vector.shape_cast %26 : vector<4x16x8xf32> to vector<8x8x8xf32>
    %28 = vector.extract_strided_slice %7 {offsets = [0, 64], sizes = [16, 8], strides = [1, 1]} : vector<16x96xf32> to vector<16x8xf32>
    %29 = vector.extract_strided_slice %7 {offsets = [0, 72], sizes = [16, 8], strides = [1, 1]} : vector<16x96xf32> to vector<16x8xf32>
    %30 = vector.extract_strided_slice %7 {offsets = [0, 80], sizes = [16, 8], strides = [1, 1]} : vector<16x96xf32> to vector<16x8xf32>
    %31 = vector.extract_strided_slice %7 {offsets = [0, 88], sizes = [16, 8], strides = [1, 1]} : vector<16x96xf32> to vector<16x8xf32>
    %32 = vector.shape_cast %28 : vector<16x8xf32> to vector<1x16x8xf32>
    %33 = vector.shape_cast %29 : vector<16x8xf32> to vector<1x16x8xf32>
    %34 = vector.shape_cast %30 : vector<16x8xf32> to vector<1x16x8xf32>
    %35 = vector.shape_cast %31 : vector<16x8xf32> to vector<1x16x8xf32>
    %36 = tpu.concatenate %32, %33, %34, %35 in 0 : vector<1x16x8xf32>, vector<1x16x8xf32>, vector<1x16x8xf32>, vector<1x16x8xf32> -> vector<4x16x8xf32>
    %37 = vector.shape_cast %36 : vector<4x16x8xf32> to vector<8x8x8xf32>
    "tpu.trace_start"() <{level = 10 : i32, message = "bqd,bkd->bqk"}> : () -> ()
    %cst_7 = arith.constant dense<0.000000e+00> : vector<8x8x8xf32>
    %38 = tpu.matmul %17, %27, %cst_7 {dimension_numbers = #tpu.dot_dimension_numbers<[2], [2], [1], [1], [0, 0, 0, 1, 1, 1], [0], [0]>} : vector<8x8x8xf32>, vector<8x8x8xf32>, vector<8x8x8xf32> -> vector<8x8x8xf32>
    "tpu.trace_stop"() : () -> ()
    %cst_8 = arith.constant 0.353553385 : f32
    %39 = vector.broadcast %cst_8 : f32 to vector<8x8x8xf32>
    %40 = arith.mulf %38, %39 : vector<8x8x8xf32>
    %cst_9 = arith.constant dense<0xFF800000> : vector<8x8xf32>
    %41 = vector.multi_reduction <maximumf>, %40, %cst_9 [2] : vector<8x8x8xf32> to vector<8x8xf32>
    %42 = vector.shape_cast %41 : vector<8x8xf32> to vector<8x8x1xf32>
    %43 = vector.broadcast %42 : vector<8x8x1xf32> to vector<8x8x8xf32>
    %44 = arith.subf %40, %43 : vector<8x8x8xf32>
    %45 = math.exp %44 : vector<8x8x8xf32>
    %cst_10 = arith.constant dense<0.000000e+00> : vector<8x8xf32>
    %46 = vector.multi_reduction <add>, %45, %cst_10 [2] : vector<8x8x8xf32> to vector<8x8xf32>
    %47 = vector.shape_cast %46 : vector<8x8xf32> to vector<8x8x1xf32>
    %48 = tpu.reciprocal %47 : vector<8x8x1xf32> -> vector<8x8x1xf32>
    %49 = vector.broadcast %48 : vector<8x8x1xf32> to vector<8x8x8xf32>
    %50 = arith.mulf %45, %49 : vector<8x8x8xf32>
    "tpu.trace_start"() <{level = 10 : i32, message = "bqk,bkd->bqd"}> : () -> ()
    %cst_11 = arith.constant dense<0.000000e+00> : vector<8x8x8xf32>
    %51 = tpu.matmul %50, %37, %cst_11 {dimension_numbers = #tpu.dot_dimension_numbers<[2], [1], [1], [2], [0, 0, 0, 1, 1, 2], [0], [0]>} : vector<8x8x8xf32>, vector<8x8x8xf32>, vector<8x8x8xf32> -> vector<8x8x8xf32>
    "tpu.trace_stop"() : () -> ()
    %52 = vector.shape_cast %51 : vector<8x8x8xf32> to vector<4x16x8xf32>
    %53 = vector.extract_strided_slice %52 {offsets = [0, 0, 0], sizes = [1, 16, 8], strides = [1, 1, 1]} : vector<4x16x8xf32> to vector<1x16x8xf32>
    %54 = vector.shape_cast %53 : vector<1x16x8xf32> to vector<16x8xf32>
    %55 = vector.extract_strided_slice %52 {offsets = [1, 0, 0], sizes = [1, 16, 8], strides = [1, 1, 1]} : vector<4x16x8xf32> to vector<1x16x8xf32>
    %56 = vector.shape_cast %55 : vector<1x16x8xf32> to vector<16x8xf32>
    %57 = vector.extract_strided_slice %52 {offsets = [2, 0, 0], sizes = [1, 16, 8], strides = [1, 1, 1]} : vector<4x16x8xf32> to vector<1x16x8xf32>
    %58 = vector.shape_cast %57 : vector<1x16x8xf32> to vector<16x8xf32>
    %59 = vector.extract_strided_slice %52 {offsets = [3, 0, 0], sizes = [1, 16, 8], strides = [1, 1, 1]} : vector<4x16x8xf32> to vector<1x16x8xf32>
    %60 = vector.shape_cast %59 : vector<1x16x8xf32> to vector<16x8xf32>
    %61 = tpu.concatenate %54, %56, %58, %60 in 1 : vector<16x8xf32>, vector<16x8xf32>, vector<16x8xf32>, vector<16x8xf32> -> vector<16x32xf32>
    %c0_12 = arith.constant 0 : index
    %c0_13 = arith.constant 0 : index
    %c0_14 = arith.constant 0 : index
    %62 = vector.load %arg4[%c0_12, %c0_13, %c0_14] : memref<2x32x32xf32, #tpu.memory_space<vmem>>, vector<1x32x32xf32>
    %63 = vector.shape_cast %62 : vector<1x32x32xf32> to vector<32x32xf32>
    %cst_15 = arith.constant dense<0.000000e+00> : vector<16x32xf32>
    %64 = tpu.matmul %61, %63, %cst_15 {dimension_numbers = #tpu.dot_dimension_numbers<[1], [0], [0], [1], [0, 0, 1, 1], [], []>} : vector<16x32xf32>, vector<32x32xf32>, vector<16x32xf32> -> vector<16x32xf32>
    %c0_16 = arith.constant 0 : index
    %c0_17 = arith.constant 0 : index
    %c0_18 = arith.constant 0 : index
    %65 = vector.load %arg5[%c0_16, %c0_17, %c0_18] : memref<2x1x32xf32, #tpu.memory_space<vmem>>, vector<1x1x32xf32>
    %66 = vector.shape_cast %65 : vector<1x1x32xf32> to vector<1x32xf32>
    %67 = vector.broadcast %66 : vector<1x32xf32> to vector<16x32xf32>
    %68 = arith.addf %64, %67 : vector<16x32xf32>
    %69 = arith.addf %0, %68 : vector<16x32xf32>
    %c0_19 = arith.constant 0 : index
    %c0_20 = arith.constant 0 : index
    %c0_21 = arith.constant 0 : index
    %70 = vector.load %arg6[%c0_19, %c0_20, %c0_21] : memref<2x1x32xf32, #tpu.memory_space<vmem>>, vector<1x1x32xf32>
    %71 = vector.shape_cast %70 : vector<1x1x32xf32> to vector<1x32xf32>
    %c0_22 = arith.constant 0 : index
    %c0_23 = arith.constant 0 : index
    %c0_24 = arith.constant 0 : index
    %72 = vector.load %arg7[%c0_22, %c0_23, %c0_24] : memref<2x1x32xf32, #tpu.memory_space<vmem>>, vector<1x1x32xf32>
    %73 = vector.shape_cast %72 : vector<1x1x32xf32> to vector<1x32xf32>
    %cst_25 = arith.constant dense<0.000000e+00> : vector<16xf32>
    %74 = vector.multi_reduction <add>, %69, %cst_25 [1] : vector<16x32xf32> to vector<16xf32>
    %75 = vector.shape_cast %74 : vector<16xf32> to vector<16x1xf32>
    %cst_26 = arith.constant 3.200000e+01 : f32
    %76 = vector.broadcast %cst_26 : f32 to vector<16x1xf32>
    %77 = arith.divf %75, %76 : vector<16x1xf32>
    %78 = vector.broadcast %77 : vector<16x1xf32> to vector<16x32xf32>
    %79 = arith.subf %69, %78 : vector<16x32xf32>
    %80 = arith.mulf %79, %79 : vector<16x32xf32>
    %cst_27 = arith.constant dense<0.000000e+00> : vector<16xf32>
    %81 = vector.multi_reduction <add>, %80, %cst_27 [1] : vector<16x32xf32> to vector<16xf32>
    %82 = vector.shape_cast %81 : vector<16xf32> to vector<16x1xf32>
    %cst_28 = arith.constant 3.200000e+01 : f32
    %83 = vector.broadcast %cst_28 : f32 to vector<16x1xf32>
    %84 = arith.divf %82, %83 : vector<16x1xf32>
    %85 = math.sqrt %84 : vector<16x1xf32>
    %86 = vector.broadcast %71 : vector<1x32xf32> to vector<16x32xf32>
    %87 = arith.mulf %86, %79 : vector<16x32xf32>
    %cst_29 = arith.constant 1.000000e-10 : f32
    %88 = vector.broadcast %cst_29 : f32 to vector<16x1xf32>
    %89 = arith.addf %85, %88 : vector<16x1xf32>
    %90 = tpu.reciprocal %89 : vector<16x1xf32> -> vector<16x1xf32>
    %91 = vector.broadcast %90 : vector<16x1xf32> to vector<16x32xf32>
    %92 = arith.mulf %87, %91 : vector<16x32xf32>
    %93 = vector.broadcast %73 : vector<1x32xf32> to vector<16x32xf32>
    %94 = arith.addf %92, %93 : vector<16x32xf32>
    %c0_30 = arith.constant 0 : index
    %c0_31 = arith.constant 0 : index
    %c0_32 = arith.constant 0 : index
    %95 = vector.load %arg8[%c0_30, %c0_31, %c0_32] : memref<2x32x64xf32, #tpu.memory_space<vmem>>, vector<1x32x64xf32>
    %96 = vector.shape_cast %95 : vector<1x32x64xf32> to vector<32x64xf32>
    %cst_33 = arith.constant dense<0.000000e+00> : vector<16x64xf32>
    %97 = tpu.matmul %94, %96, %cst_33 {dimension_numbers = #tpu.dot_dimension_numbers<[1], [0], [0], [1], [0, 0, 1, 1], [], []>} : vector<16x32xf32>, vector<32x64xf32>, vector<16x64xf32> -> vector<16x64xf32>
    %c0_34 = arith.constant 0 : index
    %c0_35 = arith.constant 0 : index
    %c0_36 = arith.constant 0 : index
    %98 = vector.load %arg9[%c0_34, %c0_35, %c0_36] : memref<2x1x64xf32, #tpu.memory_space<vmem>>, vector<1x1x64xf32>
    %99 = vector.shape_cast %98 : vector<1x1x64xf32> to vector<1x64xf32>
    %100 = vector.broadcast %99 : vector<1x64xf32> to vector<16x64xf32>
    %101 = arith.addf %97, %100 : vector<16x64xf32>
    %cst_37 = arith.constant 0.000000e+00 : f32
    %102 = vector.broadcast %cst_37 : f32 to vector<16x64xf32>
    %103 = arith.maximumf %101, %102 : vector<16x64xf32>
    %c0_38 = arith.constant 0 : index
    %c0_39 = arith.constant 0 : index
    %c0_40 = arith.constant 0 : index
    %104 = vector.load %arg10[%c0_38, %c0_39, %c0_40] : memref<2x64x32xf32, #tpu.memory_space<vmem>>, vector<1x64x32xf32>
    %105 = vector.shape_cast %104 : vector<1x64x32xf32> to vector<64x32xf32>
    %cst_41 = arith.constant dense<0.000000e+00> : vector<16x32xf32>
    %106 = tpu.matmul %103, %105, %cst_41 {dimension_numbers = #tpu.dot_dimension_numbers<[1], [0], [0], [1], [0, 0, 1, 1], [], []>} : vector<16x64xf32>, vector<64x32xf32>, vector<16x32xf32> -> vector<16x32xf32>
    %c0_42 = arith.constant 0 : index
    %c0_43 = arith.constant 0 : index
    %c0_44 = arith.constant 0 : index
    %107 = vector.load %arg11[%c0_42, %c0_43, %c0_44] : memref<2x1x32xf32, #tpu.memory_space<vmem>>, vector<1x1x32xf32>
    %108 = vector.shape_cast %107 : vector<1x1x32xf32> to vector<1x32xf32>
    %109 = vector.broadcast %108 : vector<1x32xf32> to vector<16x32xf32>
    %110 = arith.addf %106, %109 : vector<16x32xf32>
    %111 = arith.addf %94, %110 : vector<16x32xf32>
    %c0_45 = arith.constant 0 : index
    %c0_46 = arith.constant 0 : index
    %c0_47 = arith.constant 0 : index
    %112 = vector.load %arg12[%c0_45, %c0_46, %c0_47] : memref<2x1x32xf32, #tpu.memory_space<vmem>>, vector<1x1x32xf32>
    %113 = vector.shape_cast %112 : vector<1x1x32xf32> to vector<1x32xf32>
    %c0_48 = arith.constant 0 : index
    %c0_49 = arith.constant 0 : index
    %c0_50 = arith.constant 0 : index
    %114 = vector.load %arg13[%c0_48, %c0_49, %c0_50] : memref<2x1x32xf32, #tpu.memory_space<vmem>>, vector<1x1x32xf32>
    %115 = vector.shape_cast %114 : vector<1x1x32xf32> to vector<1x32xf32>
    %cst_51 = arith.constant dense<0.000000e+00> : vector<16xf32>
    %116 = vector.multi_reduction <add>, %111, %cst_51 [1] : vector<16x32xf32> to vector<16xf32>
    %117 = vector.shape_cast %116 : vector<16xf32> to vector<16x1xf32>
    %cst_52 = arith.constant 3.200000e+01 : f32
    %118 = vector.broadcast %cst_52 : f32 to vector<16x1xf32>
    %119 = arith.divf %117, %118 : vector<16x1xf32>
    %120 = vector.broadcast %119 : vector<16x1xf32> to vector<16x32xf32>
    %121 = arith.subf %111, %120 : vector<16x32xf32>
    %122 = arith.mulf %121, %121 : vector<16x32xf32>
    %cst_53 = arith.constant dense<0.000000e+00> : vector<16xf32>
    %123 = vector.multi_reduction <add>, %122, %cst_53 [1] : vector<16x32xf32> to vector<16xf32>
    %124 = vector.shape_cast %123 : vector<16xf32> to vector<16x1xf32>
    %cst_54 = arith.constant 3.200000e+01 : f32
    %125 = vector.broadcast %cst_54 : f32 to vector<16x1xf32>
    %126 = arith.divf %124, %125 : vector<16x1xf32>
    %127 = math.sqrt %126 : vector<16x1xf32>
    %128 = vector.broadcast %113 : vector<1x32xf32> to vector<16x32xf32>
    %129 = arith.mulf %128, %121 : vector<16x32xf32>
    %cst_55 = arith.constant 1.000000e-10 : f32
    %130 = vector.broadcast %cst_55 : f32 to vector<16x1xf32>
    %131 = arith.addf %127, %130 : vector<16x1xf32>
    %132 = tpu.reciprocal %131 : vector<16x1xf32> -> vector<16x1xf32>
    %133 = vector.broadcast %132 : vector<16x1xf32> to vector<16x32xf32>
    %134 = arith.mulf %129, %133 : vector<16x32xf32>
    %135 = vector.broadcast %115 : vector<1x32xf32> to vector<16x32xf32>
    %136 = arith.addf %134, %135 : vector<16x32xf32>
    %c1 = arith.constant 1 : index
    %c0_56 = arith.constant 0 : index
    %c0_57 = arith.constant 0 : index
    %137 = vector.load %arg2[%c1, %c0_56, %c0_57] : memref<2x32x96xf32, #tpu.memory_space<vmem>>, vector<1x32x96xf32>
    %138 = vector.shape_cast %137 : vector<1x32x96xf32> to vector<32x96xf32>
    %cst_58 = arith.constant dense<0.000000e+00> : vector<16x96xf32>
    %139 = tpu.matmul %136, %138, %cst_58 {dimension_numbers = #tpu.dot_dimension_numbers<[1], [0], [0], [1], [0, 0, 1, 1], [], []>} : vector<16x32xf32>, vector<32x96xf32>, vector<16x96xf32> -> vector<16x96xf32>
    %c1_59 = arith.constant 1 : index
    %c0_60 = arith.constant 0 : index
    %c0_61 = arith.constant 0 : index
    %140 = vector.load %arg3[%c1_59, %c0_60, %c0_61] : memref<2x1x96xf32, #tpu.memory_space<vmem>>, vector<1x1x96xf32>
    %141 = vector.shape_cast %140 : vector<1x1x96xf32> to vector<1x96xf32>
    %142 = vector.broadcast %141 : vector<1x96xf32> to vector<16x96xf32>
    %143 = arith.addf %139, %142 : vector<16x96xf32>
    %144 = vector.extract_strided_slice %143 {offsets = [0, 0], sizes = [16, 8], strides = [1, 1]} : vector<16x96xf32> to vector<16x8xf32>
    %145 = vector.extract_strided_slice %143 {offsets = [0, 8], sizes = [16, 8], strides = [1, 1]} : vector<16x96xf32> to vector<16x8xf32>
    %146 = vector.extract_strided_slice %143 {offsets = [0, 16], sizes = [16, 8], strides = [1, 1]} : vector<16x96xf32> to vector<16x8xf32>
    %147 = vector.extract_strided_slice %143 {offsets = [0, 24], sizes = [16, 8], strides = [1, 1]} : vector<16x96xf32> to vector<16x8xf32>
    %148 = vector.shape_cast %144 : vector<16x8xf32> to vector<1x16x8xf32>
    %149 = vector.shape_cast %145 : vector<16x8xf32> to vector<1x16x8xf32>
    %150 = vector.shape_cast %146 : vector<16x8xf32> to vector<1x16x8xf32>
    %151 = vector.shape_cast %147 : vector<16x8xf32> to vector<1x16x8xf32>
    %152 = tpu.concatenate %148, %149, %150, %151 in 0 : vector<1x16x8xf32>, vector<1x16x8xf32>, vector<1x16x8xf32>, vector<1x16x8xf32> -> vector<4x16x8xf32>
    %153 = vector.shape_cast %152 : vector<4x16x8xf32> to vector<8x8x8xf32>
    %154 = vector.extract_strided_slice %143 {offsets = [0, 32], sizes = [16, 8], strides = [1, 1]} : vector<16x96xf32> to vector<16x8xf32>
    %155 = vector.extract_strided_slice %143 {offsets = [0, 40], sizes = [16, 8], strides = [1, 1]} : vector<16x96xf32> to vector<16x8xf32>
    %156 = vector.extract_strided_slice %143 {offsets = [0, 48], sizes = [16, 8], strides = [1, 1]} : vector<16x96xf32> to vector<16x8xf32>
    %157 = vector.extract_strided_slice %143 {offsets = [0, 56], sizes = [16, 8], strides = [1, 1]} : vector<16x96xf32> to vector<16x8xf32>
    %158 = vector.shape_cast %154 : vector<16x8xf32> to vector<1x16x8xf32>
    %159 = vector.shape_cast %155 : vector<16x8xf32> to vector<1x16x8xf32>
    %160 = vector.shape_cast %156 : vector<16x8xf32> to vector<1x16x8xf32>
    %161 = vector.shape_cast %157 : vector<16x8xf32> to vector<1x16x8xf32>
    %162 = tpu.concatenate %158, %159, %160, %161 in 0 : vector<1x16x8xf32>, vector<1x16x8xf32>, vector<1x16x8xf32>, vector<1x16x8xf32> -> vector<4x16x8xf32>
    %163 = vector.shape_cast %162 : vector<4x16x8xf32> to vector<8x8x8xf32>
    %164 = vector.extract_strided_slice %143 {offsets = [0, 64], sizes = [16, 8], strides = [1, 1]} : vector<16x96xf32> to vector<16x8xf32>
    %165 = vector.extract_strided_slice %143 {offsets = [0, 72], sizes = [16, 8], strides = [1, 1]} : vector<16x96xf32> to vector<16x8xf32>
    %166 = vector.extract_strided_slice %143 {offsets = [0, 80], sizes = [16, 8], strides = [1, 1]} : vector<16x96xf32> to vector<16x8xf32>
    %167 = vector.extract_strided_slice %143 {offsets = [0, 88], sizes = [16, 8], strides = [1, 1]} : vector<16x96xf32> to vector<16x8xf32>
    %168 = vector.shape_cast %164 : vector<16x8xf32> to vector<1x16x8xf32>
    %169 = vector.shape_cast %165 : vector<16x8xf32> to vector<1x16x8xf32>
    %170 = vector.shape_cast %166 : vector<16x8xf32> to vector<1x16x8xf32>
    %171 = vector.shape_cast %167 : vector<16x8xf32> to vector<1x16x8xf32>
    %172 = tpu.concatenate %168, %169, %170, %171 in 0 : vector<1x16x8xf32>, vector<1x16x8xf32>, vector<1x16x8xf32>, vector<1x16x8xf32> -> vector<4x16x8xf32>
    %173 = vector.shape_cast %172 : vector<4x16x8xf32> to vector<8x8x8xf32>
    "tpu.trace_start"() <{level = 10 : i32, message = "bqd,bkd->bqk"}> : () -> ()
    %cst_62 = arith.constant dense<0.000000e+00> : vector<8x8x8xf32>
    %174 = tpu.matmul %153, %163, %cst_62 {dimension_numbers = #tpu.dot_dimension_numbers<[2], [2], [1], [1], [0, 0, 0, 1, 1, 1], [0], [0]>} : vector<8x8x8xf32>, vector<8x8x8xf32>, vector<8x8x8xf32> -> vector<8x8x8xf32>
    "tpu.trace_stop"() : () -> ()
    %cst_63 = arith.constant 0.353553385 : f32
    %175 = vector.broadcast %cst_63 : f32 to vector<8x8x8xf32>
    %176 = arith.mulf %174, %175 : vector<8x8x8xf32>
    %cst_64 = arith.constant dense<0xFF800000> : vector<8x8xf32>
    %177 = vector.multi_reduction <maximumf>, %176, %cst_64 [2] : vector<8x8x8xf32> to vector<8x8xf32>
    %178 = vector.shape_cast %177 : vector<8x8xf32> to vector<8x8x1xf32>
    %179 = vector.broadcast %178 : vector<8x8x1xf32> to vector<8x8x8xf32>
    %180 = arith.subf %176, %179 : vector<8x8x8xf32>
    %181 = math.exp %180 : vector<8x8x8xf32>
    %cst_65 = arith.constant dense<0.000000e+00> : vector<8x8xf32>
    %182 = vector.multi_reduction <add>, %181, %cst_65 [2] : vector<8x8x8xf32> to vector<8x8xf32>
    %183 = vector.shape_cast %182 : vector<8x8xf32> to vector<8x8x1xf32>
    %184 = tpu.reciprocal %183 : vector<8x8x1xf32> -> vector<8x8x1xf32>
    %185 = vector.broadcast %184 : vector<8x8x1xf32> to vector<8x8x8xf32>
    %186 = arith.mulf %181, %185 : vector<8x8x8xf32>
    "tpu.trace_start"() <{level = 10 : i32, message = "bqk,bkd->bqd"}> : () -> ()
    %cst_66 = arith.constant dense<0.000000e+00> : vector<8x8x8xf32>
    %187 = tpu.matmul %186, %173, %cst_66 {dimension_numbers = #tpu.dot_dimension_numbers<[2], [1], [1], [2], [0, 0, 0, 1, 1, 2], [0], [0]>} : vector<8x8x8xf32>, vector<8x8x8xf32>, vector<8x8x8xf32> -> vector<8x8x8xf32>
    "tpu.trace_stop"() : () -> ()
    %188 = vector.shape_cast %187 : vector<8x8x8xf32> to vector<4x16x8xf32>
    %189 = vector.extract_strided_slice %188 {offsets = [0, 0, 0], sizes = [1, 16, 8], strides = [1, 1, 1]} : vector<4x16x8xf32> to vector<1x16x8xf32>
    %190 = vector.shape_cast %189 : vector<1x16x8xf32> to vector<16x8xf32>
    %191 = vector.extract_strided_slice %188 {offsets = [1, 0, 0], sizes = [1, 16, 8], strides = [1, 1, 1]} : vector<4x16x8xf32> to vector<1x16x8xf32>
    %192 = vector.shape_cast %191 : vector<1x16x8xf32> to vector<16x8xf32>
    %193 = vector.extract_strided_slice %188 {offsets = [2, 0, 0], sizes = [1, 16, 8], strides = [1, 1, 1]} : vector<4x16x8xf32> to vector<1x16x8xf32>
    %194 = vector.shape_cast %193 : vector<1x16x8xf32> to vector<16x8xf32>
    %195 = vector.extract_strided_slice %188 {offsets = [3, 0, 0], sizes = [1, 16, 8], strides = [1, 1, 1]} : vector<4x16x8xf32> to vector<1x16x8xf32>
    %196 = vector.shape_cast %195 : vector<1x16x8xf32> to vector<16x8xf32>
    %197 = tpu.concatenate %190, %192, %194, %196 in 1 : vector<16x8xf32>, vector<16x8xf32>, vector<16x8xf32>, vector<16x8xf32> -> vector<16x32xf32>
    %c1_67 = arith.constant 1 : index
    %c0_68 = arith.constant 0 : index
    %c0_69 = arith.constant 0 : index
    %198 = vector.load %arg4[%c1_67, %c0_68, %c0_69] : memref<2x32x32xf32, #tpu.memory_space<vmem>>, vector<1x32x32xf32>
    %199 = vector.shape_cast %198 : vector<1x32x32xf32> to vector<32x32xf32>
    %cst_70 = arith.constant dense<0.000000e+00> : vector<16x32xf32>
    %200 = tpu.matmul %197, %199, %cst_70 {dimension_numbers = #tpu.dot_dimension_numbers<[1], [0], [0], [1], [0, 0, 1, 1], [], []>} : vector<16x32xf32>, vector<32x32xf32>, vector<16x32xf32> -> vector<16x32xf32>
    %c1_71 = arith.constant 1 : index
    %c0_72 = arith.constant 0 : index
    %c0_73 = arith.constant 0 : index
    %201 = vector.load %arg5[%c1_71, %c0_72, %c0_73] : memref<2x1x32xf32, #tpu.memory_space<vmem>>, vector<1x1x32xf32>
    %202 = vector.shape_cast %201 : vector<1x1x32xf32> to vector<1x32xf32>
    %203 = vector.broadcast %202 : vector<1x32xf32> to vector<16x32xf32>
    %204 = arith.addf %200, %203 : vector<16x32xf32>
    %205 = arith.addf %136, %204 : vector<16x32xf32>
    %c1_74 = arith.constant 1 : index
    %c0_75 = arith.constant 0 : index
    %c0_76 = arith.constant 0 : index
    %206 = vector.load %arg6[%c1_74, %c0_75, %c0_76] : memref<2x1x32xf32, #tpu.memory_space<vmem>>, vector<1x1x32xf32>
    %207 = vector.shape_cast %206 : vector<1x1x32xf32> to vector<1x32xf32>
    %c1_77 = arith.constant 1 : index
    %c0_78 = arith.constant 0 : index
    %c0_79 = arith.constant 0 : index
    %208 = vector.load %arg7[%c1_77, %c0_78, %c0_79] : memref<2x1x32xf32, #tpu.memory_space<vmem>>, vector<1x1x32xf32>
    %209 = vector.shape_cast %208 : vector<1x1x32xf32> to vector<1x32xf32>
    %cst_80 = arith.constant dense<0.000000e+00> : vector<16xf32>
    %210 = vector.multi_reduction <add>, %205, %cst_80 [1] : vector<16x32xf32> to vector<16xf32>
    %211 = vector.shape_cast %210 : vector<16xf32> to vector<16x1xf32>
    %cst_81 = arith.constant 3.200000e+01 : f32
    %212 = vector.broadcast %cst_81 : f32 to vector<16x1xf32>
    %213 = arith.divf %211, %212 : vector<16x1xf32>
    %214 = vector.broadcast %213 : vector<16x1xf32> to vector<16x32xf32>
    %215 = arith.subf %205, %214 : vector<16x32xf32>
    %216 = arith.mulf %215, %215 : vector<16x32xf32>
    %cst_82 = arith.constant dense<0.000000e+00> : vector<16xf32>
    %217 = vector.multi_reduction <add>, %216, %cst_82 [1] : vector<16x32xf32> to vector<16xf32>
    %218 = vector.shape_cast %217 : vector<16xf32> to vector<16x1xf32>
    %cst_83 = arith.constant 3.200000e+01 : f32
    %219 = vector.broadcast %cst_83 : f32 to vector<16x1xf32>
    %220 = arith.divf %218, %219 : vector<16x1xf32>
    %221 = math.sqrt %220 : vector<16x1xf32>
    %222 = vector.broadcast %207 : vector<1x32xf32> to vector<16x32xf32>
    %223 = arith.mulf %222, %215 : vector<16x32xf32>
    %cst_84 = arith.constant 1.000000e-10 : f32
    %224 = vector.broadcast %cst_84 : f32 to vector<16x1xf32>
    %225 = arith.addf %221, %224 : vector<16x1xf32>
    %226 = tpu.reciprocal %225 : vector<16x1xf32> -> vector<16x1xf32>
    %227 = vector.broadcast %226 : vector<16x1xf32> to vector<16x32xf32>
    %228 = arith.mulf %223, %227 : vector<16x32xf32>
    %229 = vector.broadcast %209 : vector<1x32xf32> to vector<16x32xf32>
    %230 = arith.addf %228, %229 : vector<16x32xf32>
    %c1_85 = arith.constant 1 : index
    %c0_86 = arith.constant 0 : index
    %c0_87 = arith.constant 0 : index
    %231 = vector.load %arg8[%c1_85, %c0_86, %c0_87] : memref<2x32x64xf32, #tpu.memory_space<vmem>>, vector<1x32x64xf32>
    %232 = vector.shape_cast %231 : vector<1x32x64xf32> to vector<32x64xf32>
    %cst_88 = arith.constant dense<0.000000e+00> : vector<16x64xf32>
    %233 = tpu.matmul %230, %232, %cst_88 {dimension_numbers = #tpu.dot_dimension_numbers<[1], [0], [0], [1], [0, 0, 1, 1], [], []>} : vector<16x32xf32>, vector<32x64xf32>, vector<16x64xf32> -> vector<16x64xf32>
    %c1_89 = arith.constant 1 : index
    %c0_90 = arith.constant 0 : index
    %c0_91 = arith.constant 0 : index
    %234 = vector.load %arg9[%c1_89, %c0_90, %c0_91] : memref<2x1x64xf32, #tpu.memory_space<vmem>>, vector<1x1x64xf32>
    %235 = vector.shape_cast %234 : vector<1x1x64xf32> to vector<1x64xf32>
    %236 = vector.broadcast %235 : vector<1x64xf32> to vector<16x64xf32>
    %237 = arith.addf %233, %236 : vector<16x64xf32>
    %cst_92 = arith.constant 0.000000e+00 : f32
    %238 = vector.broadcast %cst_92 : f32 to vector<16x64xf32>
    %239 = arith.maximumf %237, %238 : vector<16x64xf32>
    %c1_93 = arith.constant 1 : index
    %c0_94 = arith.constant 0 : index
    %c0_95 = arith.constant 0 : index
    %240 = vector.load %arg10[%c1_93, %c0_94, %c0_95] : memref<2x64x32xf32, #tpu.memory_space<vmem>>, vector<1x64x32xf32>
    %241 = vector.shape_cast %240 : vector<1x64x32xf32> to vector<64x32xf32>
    %cst_96 = arith.constant dense<0.000000e+00> : vector<16x32xf32>
    %242 = tpu.matmul %239, %241, %cst_96 {dimension_numbers = #tpu.dot_dimension_numbers<[1], [0], [0], [1], [0, 0, 1, 1], [], []>} : vector<16x64xf32>, vector<64x32xf32>, vector<16x32xf32> -> vector<16x32xf32>
    %c1_97 = arith.constant 1 : index
    %c0_98 = arith.constant 0 : index
    %c0_99 = arith.constant 0 : index
    %243 = vector.load %arg11[%c1_97, %c0_98, %c0_99] : memref<2x1x32xf32, #tpu.memory_space<vmem>>, vector<1x1x32xf32>
    %244 = vector.shape_cast %243 : vector<1x1x32xf32> to vector<1x32xf32>
    %245 = vector.broadcast %244 : vector<1x32xf32> to vector<16x32xf32>
    %246 = arith.addf %242, %245 : vector<16x32xf32>
    %247 = arith.addf %230, %246 : vector<16x32xf32>
    %c1_100 = arith.constant 1 : index
    %c0_101 = arith.constant 0 : index
    %c0_102 = arith.constant 0 : index
    %248 = vector.load %arg12[%c1_100, %c0_101, %c0_102] : memref<2x1x32xf32, #tpu.memory_space<vmem>>, vector<1x1x32xf32>
    %249 = vector.shape_cast %248 : vector<1x1x32xf32> to vector<1x32xf32>
    %c1_103 = arith.constant 1 : index
    %c0_104 = arith.constant 0 : index
    %c0_105 = arith.constant 0 : index
    %250 = vector.load %arg13[%c1_103, %c0_104, %c0_105] : memref<2x1x32xf32, #tpu.memory_space<vmem>>, vector<1x1x32xf32>
    %251 = vector.shape_cast %250 : vector<1x1x32xf32> to vector<1x32xf32>
    %cst_106 = arith.constant dense<0.000000e+00> : vector<16xf32>
    %252 = vector.multi_reduction <add>, %247, %cst_106 [1] : vector<16x32xf32> to vector<16xf32>
    %253 = vector.shape_cast %252 : vector<16xf32> to vector<16x1xf32>
    %cst_107 = arith.constant 3.200000e+01 : f32
    %254 = vector.broadcast %cst_107 : f32 to vector<16x1xf32>
    %255 = arith.divf %253, %254 : vector<16x1xf32>
    %256 = vector.broadcast %255 : vector<16x1xf32> to vector<16x32xf32>
    %257 = arith.subf %247, %256 : vector<16x32xf32>
    %258 = arith.mulf %257, %257 : vector<16x32xf32>
    %cst_108 = arith.constant dense<0.000000e+00> : vector<16xf32>
    %259 = vector.multi_reduction <add>, %258, %cst_108 [1] : vector<16x32xf32> to vector<16xf32>
    %260 = vector.shape_cast %259 : vector<16xf32> to vector<16x1xf32>
    %cst_109 = arith.constant 3.200000e+01 : f32
    %261 = vector.broadcast %cst_109 : f32 to vector<16x1xf32>
    %262 = arith.divf %260, %261 : vector<16x1xf32>
    %263 = math.sqrt %262 : vector<16x1xf32>
    %264 = vector.broadcast %249 : vector<1x32xf32> to vector<16x32xf32>
    %265 = arith.mulf %264, %257 : vector<16x32xf32>
    %cst_110 = arith.constant 1.000000e-10 : f32
    %266 = vector.broadcast %cst_110 : f32 to vector<16x1xf32>
    %267 = arith.addf %263, %266 : vector<16x1xf32>
    %268 = tpu.reciprocal %267 : vector<16x1xf32> -> vector<16x1xf32>
    %269 = vector.broadcast %268 : vector<16x1xf32> to vector<16x32xf32>
    %270 = arith.mulf %265, %269 : vector<16x32xf32>
    %271 = vector.broadcast %251 : vector<1x32xf32> to vector<16x32xf32>
    %272 = arith.addf %270, %271 : vector<16x32xf32>
    %c0_111 = arith.constant 0 : index
    %c0_112 = arith.constant 0 : index
    %273 = vector.load %arg14[%c0_111, %c0_112] : memref<16x32xf32, #tpu.memory_space<vmem>>, vector<16x32xf32>
    tpu.vector_store %arg14[%c0_111, %c0_112], %272 {strides = array<i32>} : memref<16x32xf32, #tpu.memory_space<vmem>>, vector<16x32xf32>,
    return
  }
  func.func @transform_0(%arg0: i32) -> (i32, i32) {
    %c0_i32 = arith.constant 0 : i32
    %c0_i32_0 = arith.constant 0 : i32
    return %arg0, %c0_i32 : i32, i32
  }
  func.func @transform_1(%arg0: i32) -> (i32, i32, i32) {
    %c0_i32 = arith.constant 0 : i32
    %c0_i32_0 = arith.constant 0 : i32
    %c0_i32_1 = arith.constant 0 : i32
    %c0_i32_2 = arith.constant 0 : i32
    return %c0_i32, %c0_i32_0, %c0_i32_1 : i32, i32, i32
  }
  func.func @transform_2(%arg0: i32) -> (i32, i32, i32) {
    %c0_i32 = arith.constant 0 : i32
    %c0_i32_0 = arith.constant 0 : i32
    %c0_i32_1 = arith.constant 0 : i32
    %c0_i32_2 = arith.constant 0 : i32
    return %c0_i32, %c0_i32_0, %c0_i32_1 : i32, i32, i32
  }
  func.func @transform_3(%arg0: i32) -> (i32, i32, i32) {
    %c0_i32 = arith.constant 0 : i32
    %c0_i32_0 = arith.constant 0 : i32
    %c0_i32_1 = arith.constant 0 : i32
    %c0_i32_2 = arith.constant 0 : i32
    return %c0_i32, %c0_i32_0, %c0_i32_1 : i32, i32, i32
  }
  func.func @transform_4(%arg0: i32) -> (i32, i32, i32) {
    %c0_i32 = arith.constant 0 : i32
    %c0_i32_0 = arith.constant 0 : i32
    %c0_i32_1 = arith.constant 0 : i32
    %c0_i32_2 = arith.constant 0 : i32
    return %c0_i32, %c0_i32_0, %c0_i32_1 : i32, i32, i32
  }
  func.func @transform_5(%arg0: i32) -> (i32, i32, i32) {
    %c0_i32 = arith.constant 0 : i32
    %c0_i32_0 = arith.constant 0 : i32
    %c0_i32_1 = arith.constant 0 : i32
    %c0_i32_2 = arith.constant 0 : i32
    return %c0_i32, %c0_i32_0, %c0_i32_1 : i32, i32, i32
  }
  func.func @transform_6(%arg0: i32) -> (i32, i32, i32) {
    %c0_i32 = arith.constant 0 : i32
    %c0_i32_0 = arith.constant 0 : i32
    %c0_i32_1 = arith.constant 0 : i32
    %c0_i32_2 = arith.constant 0 : i32
    return %c0_i32, %c0_i32_0, %c0_i32_1 : i32, i32, i32
  }
  func.func @transform_7(%arg0: i32) -> (i32, i32, i32) {
    %c0_i32 = arith.constant 0 : i32
    %c0_i32_0 = arith.constant 0 : i32
    %c0_i32_1 = arith.constant 0 : i32
    %c0_i32_2 = arith.constant 0 : i32
    return %c0_i32, %c0_i32_0, %c0_i32_1 : i32, i32, i32
  }
  func.func @transform_8(%arg0: i32) -> (i32, i32, i32) {
    %c0_i32 = arith.constant 0 : i32
    %c0_i32_0 = arith.constant 0 : i32
    %c0_i32_1 = arith.constant 0 : i32
    %c0_i32_2 = arith.constant 0 : i32
    return %c0_i32, %c0_i32_0, %c0_i32_1 : i32, i32, i32
  }
  func.func @transform_9(%arg0: i32) -> (i32, i32, i32) {
    %c0_i32 = arith.constant 0 : i32
    %c0_i32_0 = arith.constant 0 : i32
    %c0_i32_1 = arith.constant 0 : i32
    %c0_i32_2 = arith.constant 0 : i32
    return %c0_i32, %c0_i32_0, %c0_i32_1 : i32, i32, i32
  }
  func.func @transform_10(%arg0: i32) -> (i32, i32, i32) {
    %c0_i32 = arith.constant 0 : i32
    %c0_i32_0 = arith.constant 0 : i32
    %c0_i32_1 = arith.constant 0 : i32
    %c0_i32_2 = arith.constant 0 : i32
    return %c0_i32, %c0_i32_0, %c0_i32_1 : i32, i32, i32
  }
  func.func @transform_11(%arg0: i32) -> (i32, i32, i32) {
    %c0_i32 = arith.constant 0 : i32
    %c0_i32_0 = arith.constant 0 : i32
    %c0_i32_1 = arith.constant 0 : i32
    %c0_i32_2 = arith.constant 0 : i32
    return %c0_i32, %c0_i32_0, %c0_i32_1 : i32, i32, i32
  }
  func.func @transform_12(%arg0: i32) -> (i32, i32, i32) {
    %c0_i32 = arith.constant 0 : i32
    %c0_i32_0 = arith.constant 0 : i32
    %c0_i32_1 = arith.constant 0 : i32
    %c0_i32_2 = arith.constant 0 : i32
    return %c0_i32, %c0_i32_0, %c0_i32_1 : i32, i32, i32
  }
  func.func @transform_13(%arg0: i32) -> (i32, i32) {
    %c0_i32 = arith.constant 0 : i32
    %c0_i32_0 = arith.constant 0 : i32
    return %arg0, %c0_i32 : i32, i32
  }
}

</mosaic_0001>

<bundles_post_ra>
// kernel: tpu_custom_call.1
= control target key start
LH: loop header
LB: loop body
LE: loop exit
PB: predicated region body
PF: predicated region fallthrough
CT: control target
= control target key end

     0   :  { %18 = vsyncpa [#allocation3], 0  ;;  %s5124_s0 = inlined_call_operand.hbm [shape: f32[16,32], index: 0, kind: input, shape index: {}]   ;;  %s5125_s1 = inlined_call_operand.vmem [shape: f32[2,32,96], index: 1, kind: input, shape index: {}]   ;;  %s5126_s2 = inlined_call_operand.vmem [shape: f32[2,1,96], index: 2, kind: input, shape index: {}]   ;;  %s5127_s3 = inlined_call_operand.vmem [shape: f32[2,32,32], index: 3, kind: input, shape index: {}]   ;;  %s5128_s4 = inlined_call_operand.vmem [shape: f32[2,1,32], index: 4, kind: input, shape index: {}]   ;;  %s5129_s5 = inlined_call_operand.vmem [shape: f32[2,1,32], index: 5, kind: input, shape index: {}]   ;;  %s5130_s6 = inlined_call_operand.vmem [shape: f32[2,1,32], index: 6, kind: input, shape index: {}]   ;;  %s5131_s7 = inlined_call_operand.vmem [shape: f32[2,32,64], index: 7, kind: input, shape index: {}]   ;;  %s5132_s8 = inlined_call_operand.vmem [shape: f32[2,1,64], index: 8, kind: input, shape index: {}]   ;;  %s5133_s9 = inlined_call_operand.vmem [shape: f32[2,64,32], index: 9, kind: input, shape index: {}]   ;;  %s5134_s10 = inlined_call_operand.vmem [shape: f32[2,1,32], index: 10, kind: input, shape index: {}]   ;;  %s5135_s11 = inlined_call_operand.vmem [shape: f32[2,1,32], index: 11, kind: input, shape index: {}]   ;;  %s5136_s12 = inlined_call_operand.vmem [shape: f32[2,1,32], index: 12, kind: input, shape index: {}]   ;;  %s5137_s13 = inlined_call_operand.hbm [shape: f32[16,32], index: 13, kind: output, shape index: {}]  }
   0x1   :  { %19 = vsyncpa [#allocation4], 0  ;;  %s4443_s25 = smov [#allocation2]  }
   0x2   :  { %s25_s26 = sshll.u32 %s4443_s25, 4  ;;  %s26_s26 = int_to_ptr.vmem [resolvable:$true] %s25_s26 }
   0x3   :  { %s4407_s27 = scalar_lea.vmem %s26_s26, 256  ;;  %p4412_p1 = scmp.lt.s32.totalorder %s26_s26, %s26_s26 }
   0x4   :  { %p4408_p0 = scmp.ne.s32.totalorder %s26_s26, %s4407_s27  ;;  %p4413_p2 = scmp.lt.s32.totalorder %s4407_s27, %s4407_s27 }
   0x6   :  { %p4414_p3 = por %p4413_p2, %p4412_p1 }
   0x8   :  { %p4415_p4 = pnand %p4414_p3, %p4408_p0 }
   0xa   :  { %4418 = shalt.err (!%p4415_p4)
}
   0xb   :  { %s4444_s28 = smov 128   ;;  %s4445_s29 = smov 8  }
   0xc   :  { %31 = dma.hbm_to_vmem [thread:$0]  %s5124_s0, 256, %s26_s26, [#allocation3], %s4444_s28, %s4444_s28, %s4445_s29  }
   0xd   :  { %4439 = dma.done.wait [#allocation3], 256  }
   0xe   :  { %4440 = vsyncadd [#allocation3], 4294967040  ;;  %vm72_vm0 = vcmask 261120   ;;  %v64_v0 = vld [vmem:[%s5125_s1 + $0x18] sm:$0xff]  ;;  %v63_v1 = vld [vmem:[%s5125_s1 + $0x10] sm:$0xff]  ;;  %v4446_v7 = vmov 0.0  }
   0xf   :  { %4026 = vmatprep.subr.mxu1 %v64_v0  ;;  %v4538_v2 = vld [vmem:[#allocation2] sm:$0xff]  ;;  %v62_v3 = vld [vmem:[%s5125_s1 + $0x8] sm:$0xff]  ;;  %4047 = vmatprep.subr.mxu0 %v4446_v7  ;;  %s4447_s24 = smov 112   ;;  %s4448_s25 = smov 120   ;;  %vm4449_vm1 = vmmov 0   ;;  %vm170_vm2 = vcmask 64512  }
  0x10   :  { %4027 = vmatpush3.msra.mxu1 %v64_v0  ;;  %4034 = vmatprep.mubr.msk.f32.mxu1 %vm72_vm0, %v4538_v2  ;;  %v61_v4 = vld [vmem:[%s5125_s1] sm:$0xff]  ;;  %v4548_v5 = vld [vmem:[#allocation2 + $0x8] sm:$0xff]  ;;  %s4450_s26 = smov 104   ;;  %s4451_s27 = smov 96   ;;  %vm1507_vm3 = vcmask 130048   ;;  %vm1510_vm4 = vcmask 195584  }
  0x11   :  { %4028 = vmatprep.subr.mxu1 %v63_v1  ;;  %v3798_v8 = vld [vmem:[%s5126_s2] ss:$0 sm:$0xff]  ;;  %4049 = vmatprep.mubr.msk.f32.mxu0 %vm4449_vm1, %v4446_v7  ;;  %s4452_s30 = smov 64   ;;  %s4453_s21 = smov 16   ;;  %vm1775_vm9 = vcmask 523264  }
  0x12   :  { %4029 = vmatpush3.msra.mxu1 %v63_v1  ;;  %s4454_s22 = smov 24  }
  0x13   :  { %4030 = vmatprep.subr.mxu1 %v62_v3 }
  0x14   :  { %4031 = vmatpush3.msra.mxu1 %v62_v3 }
  0x15   :  { %4032 = vmatprep.subr.mxu1 %v61_v4 }
  0x16   :  { %4033 = vmatpush3.msra.mxu1 %v61_v4 }
  0x17   :  { %4035 = vmatmul.mubr.msk.f32.vlgmr.msra.gmra.mxu1 %vm72_vm0, %v4548_v5  ;;  %4037 = vmatprep.subr.mxu1 %v4446_v7 }
  0x18   :  { %4039 = vmatprep.mubr.msk.f32.mxu1 %vm4449_vm1, %v4446_v7 }
  0xd7   :  { %v4036_v6 = vpop.f32.mrf.mxu1 }
  0xd8   :  { %v4567_v11 = vadd.f32 %v4036_v6, %v3798_v8 }
  0xd9   :  { %v145_v9 = vpop.f32.mrf.mxu1 }
  0xda   :  { %v4557_v10 = vadd.f32 %v3798_v8, %v145_v9 }
  0xdc   :  { %160 = vrot.lane.b32.xlu1 %v4557_v10, %s4447_s24  ;;  %156 = vrot.lane.b32.xlu0 %v4557_v10, %s4448_s25 }
  0xe0   :  { %162 = vrot.lane.b32.xlu1 %v4567_v11, %s4447_s24  ;;  %158 = vrot.lane.b32.xlu0 %v4567_v11, %s4448_s25 }
  0xe4   :  { %166 = vrot.lane.b32.xlu1 %v4567_v11, %s4450_s26  ;;  %164 = vrot.lane.b32.xlu0 %v4557_v10, %s4450_s26 }
  0xe8   :  { %245 = vrot.lane.b32.xlu1 %v4567_v11, %s4451_s27  ;;  %168 = vrot.lane.b32.xlu0 %v4557_v10, %s4451_s27 }
 0x14e   :  { %v4581_v12 = vpop.permute.xlu1 %160  ;;  %v4583_v13 = vpop.permute.xlu0 %156 }
 0x14f   :  { %321 = vrot.lane.b32.xlu0 %v4583_v13, %s4451_s27 }
 0x152   :  { %v4587_v14 = vpop.permute.xlu1 %162  ;;  %v4589_v15 = vpop.permute.xlu0 %158 }
 0x153   :  { %473 = vrot.lane.b32.xlu0 %v4581_v12, %s4451_s27  ;;  %397 = vrot.lane.b32.xlu1 %v4589_v15, %s4451_s27 }
 0x156   :  { %v4595_v16 = vpop.permute.xlu0 %164  ;;  %v4601_v17 = vpop.permute.xlu1 %166 }
 0x157   :  { %549 = vrot.lane.b32.xlu1 %v4587_v14, %s4451_s27  ;;  %625 = vrot.lane.b32.xlu0 %v4595_v16, %s4451_s27 }
 0x15a   :  { %v169_v18 = vpop.permute.xlu0 %168  ;;  %v246_v19 = vpop.permute.xlu1 %245 }
 0x15b   :  { %701 = vrot.lane.b32.xlu1 %v4601_v17, %s4451_s27  ;;  %4038 = vmatpush3.xpose.msk.msra.mxu1 %vm170_vm2, %v169_v18 }
 0x15c   :  { %4042 = vmatprep.subr.mxu1 %v4446_v7 }
 0x15e   :  { %4040 = vmatmul.mubr.msk.f32.vlgmr.msra.gmra.mxu1 %vm170_vm2, %v4557_v10 }
 0x15f   :  { %4043 = vmatpush3.xpose.msk.msra.mxu1 %vm170_vm2, %v246_v19  ;;  %4044 = vmatprep.mubr.msk.f32.mxu1 %vm4449_vm1, %v4446_v7 }
 0x160   :  { %4052 = vmatprep.subr.mxu1 %v4446_v7 }
 0x162   :  { %4045 = vmatmul.mubr.msk.f32.vlgmr.msra.gmra.mxu1 %vm170_vm2, %v4567_v11 }
 0x163   :  { %4054 = vmatprep.mubr.msk.f32.mxu1 %vm4449_vm1, %v4446_v7 }
 0x1c1   :  { %v322_v20 = vpop.permute.xlu0 %321 }
 0x1c2   :  { %4048 = vmatpush3.xpose.msk.msra.mxu0 %vm170_vm2, %v322_v20 }
 0x1c3   :  { %4057 = vmatprep.subr.mxu0 %v4446_v7 }
 0x1c5   :  { %v398_v21 = vpop.permute.xlu1 %397  ;;  %4050 = vmatmul.mubr.msk.f32.vlgmr.msra.gmra.mxu0 %vm170_vm2, %v4583_v13  ;;  %v474_v22 = vpop.permute.xlu0 %473 }
 0x1c6   :  { %4053 = vmatpush3.xpose.msk.msra.mxu1 %vm170_vm2, %v398_v21  ;;  %4058 = vmatpush3.xpose.msk.msra.mxu0 %vm170_vm2, %v474_v22 }
 0x1c7   :  { %4059 = vmatprep.mubr.msk.f32.mxu0 %vm4449_vm1, %v4446_v7  ;;  %4062 = vmatprep.subr.mxu1 %v4446_v7 }
 0x1c8   :  { %4067 = vmatprep.subr.mxu0 %v4446_v7 }
 0x1c9   :  { %v550_v23 = vpop.permute.xlu1 %549  ;;  %4055 = vmatmul.mubr.msk.f32.vlgmr.msra.gmra.mxu1 %vm170_vm2, %v4589_v15  ;;  %4060 = vmatmul.mubr.msk.f32.vlgmr.msra.gmra.mxu0 %vm170_vm2, %v4581_v12  ;;  %v626_v24 = vpop.permute.xlu0 %625 }
 0x1ca   :  { %4063 = vmatpush3.xpose.msk.msra.mxu1 %vm170_vm2, %v550_v23  ;;  %4068 = vmatpush3.xpose.msk.msra.mxu0 %vm170_vm2, %v626_v24 }
 0x1cb   :  { %4064 = vmatprep.mubr.msk.f32.mxu1 %vm4449_vm1, %v4446_v7  ;;  %4069 = vmatprep.mubr.msk.f32.mxu0 %vm4449_vm1, %v4446_v7 }
 0x1cc   :  { %4072 = vmatprep.subr.mxu1 %v4446_v7  ;;  %4077 = vmatprep.subr.mxu0 %v4446_v7 }
 0x1cd   :  { %v702_v25 = vpop.permute.xlu1 %701  ;;  %4065 = vmatmul.mubr.msk.f32.vlgmr.msra.gmra.mxu1 %vm170_vm2, %v4587_v14  ;;  %4070 = vmatmul.mubr.msk.f32.vlgmr.msra.gmra.mxu0 %vm170_vm2, %v4595_v16 }
 0x1ce   :  { %4073 = vmatpush3.xpose.msk.msra.mxu1 %vm170_vm2, %v702_v25  ;;  %4074 = vmatprep.mubr.msk.f32.mxu1 %vm4449_vm1, %v4446_v7 }
 0x1cf   :  { %4082 = vmatprep.subr.mxu1 %v4446_v7  ;;  %4079 = vmatprep.mubr.msk.f32.mxu0 %vm4449_vm1, %v4446_v7 }
 0x1d1   :  { %4075 = vmatmul.mubr.msk.f32.vlgmr.msra.gmra.mxu1 %vm170_vm2, %v4601_v17 }
 0x1d2   :  { %4084 = vmatprep.mubr.msk.f32.mxu1 %vm4449_vm1, %v4446_v7 }
 0x21e   :  { %v241_v26 = vpop.f32.mrf.mxu1 }
 0x21f   :  { %v777_v27 = vmul.f32 0.35355338, %v241_v26 }
 0x220   :  { %v4041_v28 = vpop.f32.mrf.mxu1 }
 0x221   :  { %v785_v29 = vsel %vm170_vm2, %v777_v27, -inf }
 0x222   :  { %786 = vmax.xlane.f32.xlu0 %v785_v29  ;;  %v317_v30 = vpop.f32.mrf.mxu1 }
 0x223   :  { %v778_v31 = vmul.f32 0.35355338, %v317_v30 }
 0x224   :  { %v4046_v32 = vpop.f32.mrf.mxu1 }
 0x225   :  { %v788_v33 = vsel %vm170_vm2, %v778_v31, -inf }
 0x226   :  { %789 = vmax.xlane.f32.xlu1 %v788_v33 }
 0x285   :  { %v393_v34 = vpop.f32.mrf.mxu0 }
 0x286   :  { %v779_v35 = vmul.f32 0.35355338, %v393_v34 }
 0x287   :  { %v4051_v36 = vpop.f32.mrf.mxu0 }
 0x288   :  { %v791_v37 = vsel %vm170_vm2, %v779_v35, -inf }
 0x289   :  { %v469_v38 = vpop.f32.mrf.mxu1  ;;  %792 = vmax.xlane.f32.xlu0 %v791_v37  ;;  %v545_v39 = vpop.f32.mrf.mxu0 }
 0x28a   :  { %v780_v40 = vmul.f32 0.35355338, %v469_v38  ;;  %v781_v41 = vmul.f32 0.35355338, %v545_v39 }
 0x28b   :  { %v4056_v42 = vpop.f32.mrf.mxu1  ;;  %v4061_v43 = vpop.f32.mrf.mxu0 }
 0x28c   :  { %v794_v44 = vsel %vm170_vm2, %v780_v40, -inf  ;;  %v797_v45 = vsel %vm170_vm2, %v781_v41, -inf }
 0x28d   :  { %v621_v46 = vpop.f32.mrf.mxu1  ;;  %795 = vmax.xlane.f32.xlu0 %v794_v44  ;;  %798 = vmax.xlane.f32.xlu1 %v797_v45  ;;  %v697_v47 = vpop.f32.mrf.mxu0 }
 0x28e   :  { %v782_v48 = vmul.f32 0.35355338, %v621_v46  ;;  %v783_v49 = vmul.f32 0.35355338, %v697_v47 }
 0x28f   :  { %v4066_v50 = vpop.f32.mrf.mxu1  ;;  %v4071_v51 = vpop.f32.mrf.mxu0 }
 0x290   :  { %v800_v52 = vsel %vm170_vm2, %v782_v48, -inf  ;;  %v803_v53 = vsel %vm170_vm2, %v783_v49, -inf }
 0x291   :  { %v773_v54 = vpop.f32.mrf.mxu1  ;;  %801 = vmax.xlane.f32.xlu0 %v800_v52  ;;  %804 = vmax.xlane.f32.xlu1 %v803_v53 }
 0x292   :  { %v784_v55 = vmul.f32 0.35355338, %v773_v54 }
 0x293   :  { %v4076_v56 = vpop.f32.mrf.mxu1 }
 0x294   :  { %v806_v57 = vsel %vm170_vm2, %v784_v55, -inf }
 0x295   :  { %807 = vmax.xlane.f32.xlu0 %v806_v57 }
 0x2a2   :  { %873 = vrot.lane.b32.xlu1 %v4557_v10, %s4452_s30 }
 0x2a6   :  { %1025 = vrot.lane.b32.xlu1 %v4583_v13, %s4452_s30 }
 0x2aa   :  { %1101 = vrot.lane.b32.xlu1 %v4589_v15, %s4452_s30 }
 0x2ab   :  { %949 = vrot.lane.b32.xlu0 %v4567_v11, %s4452_s30  ;;  %v787_v60 = vpop.xlane.xlu0 %786 }
 0x2ac   :  { %v809_v61 = vsub.f32 %v777_v27, %v787_v60 }
 0x2ae   :  { %1253 = vrot.lane.b32.xlu1 %v4587_v14, %s4452_s30  ;;  %v817_v63 = vmul.f32 1.442695, %v809_v61 }
 0x2af   :  { %1177 = vrot.lane.b32.xlu0 %v4581_v12, %s4452_s30  ;;  %v790_v58 = vpop.xlane.xlu1 %789 }
 0x2b0   :  { %v810_v59 = vsub.f32 %v778_v31, %v790_v58 }
 0x2b2   :  { %v819_v62 = vmul.f32 1.442695, %v810_v59 }
 0x2b4   :  { %4303 = vpow2.f32 %v819_v62 }
 0x2b5   :  { %4305 = vpow2.f32 %v817_v63 }
 0x2c1   :  { %v4673_v0 = vpop.eup %4303 }
 0x2c2   :  { %v836_v1 = vsel %vm170_vm2, %v4673_v0, 0.0  ;;  %v4677_v3 = vpop.eup %4305 }
 0x2c3   :  { %v833_v4 = vsel %vm170_vm2, %v4677_v3, 0.0 }
 0x2ce   :  { %837 = vadd.xlane.f32.xlu0 %v836_v1 }
 0x2d2   :  { %834 = vadd.xlane.f32.xlu1 %v833_v4 }
 0x312   :  { %v793_v6 = vpop.xlane.xlu0 %792 }
 0x313   :  { %v811_v8 = vsub.f32 %v779_v35, %v793_v6 }
 0x315   :  { %v821_v9 = vmul.f32 1.442695, %v811_v8 }
 0x316   :  { %v799_v10 = vpop.xlane.xlu1 %798  ;;  %v796_v11 = vpop.xlane.xlu0 %795 }
 0x317   :  { %4307 = vpow2.f32 %v821_v9  ;;  %v813_v12 = vsub.f32 %v781_v41, %v799_v10  ;;  %v812_v13 = vsub.f32 %v780_v40, %v796_v11 }
 0x319   :  { %v825_v14 = vmul.f32 1.442695, %v813_v12  ;;  %v823_v15 = vmul.f32 1.442695, %v812_v13  ;;  %v1516_v12 = vld [vmem:[%s5127_s3 + $0x18] sm:$0xff]  ;;  %v1515_v13 = vld [vmem:[%s5127_s3 + $0x10] sm:$0xff] }
 0x31a   :  { %v805_v18 = vpop.xlane.xlu1 %804  ;;  %v802_v19 = vpop.xlane.xlu0 %801 }
 0x31b   :  { %4309 = vpow2.f32 %v825_v14  ;;  %v815_v20 = vsub.f32 %v783_v49, %v805_v18  ;;  %v814_v21 = vsub.f32 %v782_v48, %v802_v19  ;;  %v1514_v14 = vld [vmem:[%s5127_s3 + $0x8] sm:$0xff]  ;;  %v1513_v18 = vld [vmem:[%s5127_s3] sm:$0xff] }
 0x31c   :  { %4311 = vpow2.f32 %v823_v15 }
 0x31d   :  { %v829_v22 = vmul.f32 1.442695, %v815_v20  ;;  %v827_v23 = vmul.f32 1.442695, %v814_v21 }
 0x31e   :  { %v874_v24 = vpop.permute.xlu1 %873  ;;  %v808_v25 = vpop.xlane.xlu0 %807 }
 0x31f   :  { %4313 = vpow2.f32 %v829_v22  ;;  %v816_v26 = vsub.f32 %v784_v55, %v808_v25  ;;  %4078 = vmatpush3.msra.mxu0 %v874_v24 }
 0x320   :  { %4315 = vpow2.f32 %v827_v23  ;;  %4087 = vmatprep.subr.mxu0 %v4446_v7 }
 0x321   :  { %v831_v27 = vmul.f32 1.442695, %v816_v26 }
 0x322   :  { %v950_v28 = vpop.permute.xlu0 %949  ;;  %v1026_v41 = vpop.permute.xlu1 %1025 }
 0x323   :  { %4317 = vpow2.f32 %v831_v27  ;;  %4083 = vmatpush3.msra.mxu1 %v950_v28 }
 0x324   :  { %v4308_v29 = vpop.eup %4307  ;;  %4092 = vmatprep.subr.mxu1 %v4446_v7 }
 0x325   :  { %v839_v30 = vsel %vm170_vm2, %v4308_v29, 0.0 }
 0x326   :  { %840 = vadd.xlane.f32.xlu1 %v839_v30  ;;  %v1102_v42 = vpop.permute.xlu1 %1101  ;;  %v1178_v43 = vpop.permute.xlu0 %1177 }
 0x328   :  { %v4310_v31 = vpop.eup %4309 }
 0x329   :  { %v4312_v32 = vpop.eup %4311  ;;  %v845_v33 = vsel %vm170_vm2, %v4310_v31, 0.0 }
 0x32a   :  { %846 = vadd.xlane.f32.xlu1 %v845_v33  ;;  %v842_v34 = vsel %vm170_vm2, %v4312_v32, 0.0  ;;  %v1254_v44 = vpop.permute.xlu1 %1253 }
 0x32b   :  { %843 = vadd.xlane.f32.xlu0 %v842_v34 }
 0x32c   :  { %v4314_v35 = vpop.eup %4313 }
 0x32d   :  { %v4686_v36 = vpop.eup %4315  ;;  %v851_v37 = vsel %vm170_vm2, %v4314_v35, 0.0 }
 0x32e   :  { %852 = vadd.xlane.f32.xlu1 %v851_v37  ;;  %v848_v38 = vsel %vm170_vm2, %v4686_v36, 0.0 }
 0x32f   :  { %849 = vadd.xlane.f32.xlu0 %v848_v38 }
 0x330   :  { %v4691_v39 = vpop.eup %4317 }
 0x331   :  { %v854_v40 = vsel %vm170_vm2, %v4691_v39, 0.0 }
 0x333   :  { %855 = vadd.xlane.f32.xlu0 %v854_v40 }
 0x33f   :  { %1405 = vrot.lane.b32.xlu1 %v4601_v17, %s4452_s30 }
 0x349   :  { %1329 = vrot.lane.b32.xlu0 %v4595_v16, %s4452_s30 }
 0x357   :  { %v838_v45 = vpop.xlane.xlu0 %837 }
 0x358   :  { %4319 = vrcp.f32 %v838_v45 }
 0x35b   :  { %v835_v46 = vpop.xlane.xlu1 %834 }
 0x35c   :  { %4321 = vrcp.f32 %v835_v46 }
 0x365   :  { %v4320_v47 = vpop.eup %4319 }
 0x366   :  { %v866_v48 = vmul.f32 %v4320_v47, %v4673_v0 }
 0x368   :  { %4085 = vmatmul.mubr.msk.f32.vlgmr.msra.gmra.mxu1 %vm170_vm2, %v866_v48 }
 0x369   :  { %v4322_v49 = vpop.eup %4321  ;;  %4093 = vmatpush3.msra.mxu1 %v1102_v42  ;;  %4094 = vmatprep.mubr.msk.f32.mxu1 %vm4449_vm1, %v4446_v7  ;;  %v3825_v42 = vld [vmem:[%s5128_s4] ss:$0 sm:$0xff] }
 0x36a   :  { %v865_v16 = vmul.f32 %v4322_v49, %v4677_v3  ;;  %4102 = vmatprep.subr.mxu1 %v4446_v7 }
 0x36c   :  { %4080 = vmatmul.mubr.msk.f32.vlgmr.msra.gmra.mxu0 %vm170_vm2, %v865_v16 }
 0x36d   :  { %4088 = vmatpush3.msra.mxu0 %v1026_v41  ;;  %4089 = vmatprep.mubr.msk.f32.mxu0 %vm4449_vm1, %v4446_v7 }
 0x36e   :  { %4097 = vmatprep.subr.mxu0 %v4446_v7 }
 0x3af   :  { %v841_v17 = vpop.xlane.xlu1 %840 }
 0x3b0   :  { %4323 = vrcp.f32 %v841_v17 }
 0x3b3   :  { %v847_v50 = vpop.xlane.xlu1 %846 }
 0x3b4   :  { %4325 = vrcp.f32 %v847_v50  ;;  %v844_v51 = vpop.xlane.xlu0 %843 }
 0x3b5   :  { %4327 = vrcp.f32 %v844_v51 }
 0x3b7   :  { %v853_v52 = vpop.xlane.xlu1 %852 }
 0x3b8   :  { %4329 = vrcp.f32 %v853_v52  ;;  %v850_v53 = vpop.xlane.xlu0 %849 }
 0x3b9   :  { %4331 = vrcp.f32 %v850_v53 }
 0x3bb   :  { %v1406_v3 = vpop.permute.xlu1 %1405 }
 0x3bc   :  { %v856_v54 = vpop.xlane.xlu0 %855 }
 0x3bd   :  { %v4324_v55 = vpop.eup %4323  ;;  %4333 = vrcp.f32 %v856_v54 }
 0x3be   :  { %v867_v56 = vmul.f32 %v4324_v55, %v4308_v29 }
 0x3c0   :  { %4090 = vmatmul.mubr.msk.f32.vlgmr.msra.gmra.mxu0 %vm170_vm2, %v867_v56  ;;  %v1330_v61 = vpop.permute.xlu0 %1329 }
 0x3c1   :  { %v4326_v57 = vpop.eup %4325  ;;  %4098 = vmatpush3.msra.mxu0 %v1178_v43  ;;  %4099 = vmatprep.mubr.msk.f32.mxu0 %vm4449_vm1, %v4446_v7 }
 0x3c2   :  { %v4328_v58 = vpop.eup %4327  ;;  %4107 = vmatprep.subr.mxu0 %v4446_v7  ;;  %v869_v59 = vmul.f32 %v4326_v57, %v4310_v31 }
 0x3c3   :  { %v868_v60 = vmul.f32 %v4328_v58, %v4312_v32  ;;  %v1668_v58 = vld [vmem:[%s5131_s7 + $0x10] sm:$0xff] }
 0x3c4   :  { %4100 = vmatmul.mubr.msk.f32.vlgmr.msra.gmra.mxu0 %vm170_vm2, %v869_v59  ;;  %v1667_v59 = vld [vmem:[%s5131_s7 + $0x8] sm:$0xff] }
 0x3c5   :  { %v4330_v62 = vpop.eup %4329  ;;  %4095 = vmatmul.mubr.msk.f32.vlgmr.msra.gmra.mxu1 %vm170_vm2, %v868_v60  ;;  %4108 = vmatpush3.msra.mxu0 %v1330_v61  ;;  %v1666_v60 = vld [vmem:[%s5131_s7] sm:$0xff]  ;;  %v1767_v61 = vld [vmem:[%s5133_s9 + $0x38] sm:$0xff] }
 0x3c6   :  { %v4332_v63 = vpop.eup %4331  ;;  %4103 = vmatpush3.msra.mxu1 %v1254_v44  ;;  %4104 = vmatprep.mubr.msk.f32.mxu1 %vm4449_vm1, %v4446_v7  ;;  %v871_v0 = vmul.f32 %v4330_v62, %v4314_v35  ;;  %v1766_v62 = vld [vmem:[%s5133_s9 + $0x30] sm:$0xff] }
 0x3c7   :  { %4109 = vmatprep.mubr.msk.f32.mxu0 %vm4449_vm1, %v4446_v7  ;;  %4112 = vmatprep.subr.mxu1 %v4446_v7  ;;  %v870_v1 = vmul.f32 %v4332_v63, %v4686_v36  ;;  %v1765_v63 = vld [vmem:[%s5133_s9 + $0x28] sm:$0xff] }
 0x3c8   :  { %4110 = vmatmul.mubr.msk.f32.vlgmr.msra.gmra.mxu0 %vm170_vm2, %v871_v0  ;;  %4117 = vmatprep.subr.mxu0 %v1516_v12  ;;  %v1764_v0 = vld [vmem:[%s5133_s9 + $0x20] sm:$0xff] }
 0x3c9   :  { %4105 = vmatmul.mubr.msk.f32.vlgmr.msra.gmra.mxu1 %vm170_vm2, %v870_v1  ;;  %4118 = vmatpush3.msra.mxu0 %v1516_v12 }
 0x3ca   :  { %v4334_v4 = vpop.eup %4333  ;;  %4113 = vmatpush3.msra.mxu1 %v1406_v3  ;;  %4114 = vmatprep.mubr.msk.f32.mxu1 %vm4449_vm1, %v4446_v7 }
 0x3cb   :  { %v872_v6 = vmul.f32 %v4334_v4, %v4691_v39  ;;  %4119 = vmatprep.subr.mxu0 %v1515_v13 }
 0x3cc   :  { %4120 = vmatpush3.msra.mxu0 %v1515_v13 }
 0x3cd   :  { %4115 = vmatmul.mubr.msk.f32.vlgmr.msra.gmra.mxu1 %vm170_vm2, %v872_v6  ;;  %4121 = vmatprep.subr.mxu0 %v1514_v14 }
 0x3ce   :  { %4122 = vmatpush3.msra.mxu0 %v1514_v14 }
 0x3cf   :  { %4123 = vmatprep.subr.mxu0 %v1513_v18 }
 0x3d0   :  { %4124 = vmatpush3.msra.mxu0 %v1513_v18 }
 0x3d1   :  { %4139 = vmatprep.subr.mxu0 %v1767_v61 }
 0x428   :  { %v1021_v8 = vpop.f32.mrf.mxu1 }
 0x42a   :  { %v4086_v9 = vpop.f32.mrf.mxu1 }
 0x42c   :  { %v945_v10 = vpop.f32.mrf.mxu0 }
 0x42e   :  { %v4081_v11 = vpop.f32.mrf.mxu0 }
 0x480   :  { %v1097_v15 = vpop.f32.mrf.mxu0 }
 0x481   :  { %1483 = vrot.lane.b32.xlu0 %v1097_v15, %s4445_s29 }
 0x482   :  { %v4091_v19 = vpop.f32.mrf.mxu0 }
 0x484   :  { %v1249_v20 = vpop.f32.mrf.mxu0 }
 0x485   :  { %v1173_v21 = vpop.f32.mrf.mxu1  ;;  %1491 = vrot.lane.b32.xlu0 %v1249_v20, %s4453_s21 }
 0x486   :  { %1485 = vrot.lane.b32.xlu1 %v1173_v21, %s4445_s29  ;;  %v4101_v22 = vpop.f32.mrf.mxu0 }
 0x487   :  { %v4096_v23 = vpop.f32.mrf.mxu1  ;;  %v3828_v22 = vld [vmem:[%s5129_s5] ss:$0 sm:$0xff] }
 0x488   :  { %v1401_v24 = vpop.f32.mrf.mxu0 }
 0x489   :  { %v1325_v25 = vpop.f32.mrf.mxu1  ;;  %1499 = vrot.lane.b32.xlu0 %v1401_v24, %s4454_s22 }
 0x48a   :  { %1493 = vrot.lane.b32.xlu1 %v1325_v25, %s4453_s21  ;;  %v4111_v26 = vpop.f32.mrf.mxu0  ;;  %v3829_v25 = vld [vmem:[%s5130_s6] ss:$0 sm:$0xff] }
 0x48b   :  { %v4106_v27 = vpop.f32.mrf.mxu1 }
 0x48d   :  { %v1477_v28 = vpop.f32.mrf.mxu1 }
 0x48e   :  { %1501 = vrot.lane.b32.xlu1 %v1477_v28, %s4454_s22 }
 0x48f   :  { %v4116_v29 = vpop.f32.mrf.mxu1 }
 0x4f3   :  { %v1484_v30 = vpop.permute.xlu0 %1483 }
 0x4f4   :  { %v1505_v33 = vsel %vm170_vm2, %v945_v10, %v1484_v30 }
 0x4f7   :  { %v1492_v31 = vpop.permute.xlu0 %1491 }
 0x4f8   :  { %v1486_v32 = vpop.permute.xlu1 %1485  ;;  %v1508_v34 = vsel %vm1507_vm3, %v1505_v33, %v1492_v31  ;;  %v1762_v33 = vld [vmem:[%s5133_s9 + $0x10] sm:$0xff] }
 0x4f9   :  { %v1506_v38 = vsel %vm170_vm2, %v1021_v8, %v1486_v32  ;;  %v1763_v32 = vld [vmem:[%s5133_s9 + $0x18] sm:$0xff] }
 0x4fb   :  { %v1500_v35 = vpop.permute.xlu0 %1499 }
 0x4fc   :  { %v1494_v36 = vpop.permute.xlu1 %1493  ;;  %v1511_v37 = vsel %vm1510_vm4, %v1508_v34, %v1500_v35  ;;  %v1761_v34 = vld [vmem:[%s5133_s9 + $0x8] sm:$0xff]  ;;  %v1760_v35 = vld [vmem:[%s5133_s9] sm:$0xff] }
 0x4fd   :  { %4125 = vmatprep.mubr.msk.f32.mxu0 %vm72_vm0, %v1511_v37  ;;  %v1509_v39 = vsel %vm1507_vm3, %v1506_v38, %v1494_v36  ;;  %v3830_v36 = vld [vmem:[%s5132_s8] ss:$0 sm:$0xff] }
 0x500   :  { %v1502_v40 = vpop.permute.xlu1 %1501 }
 0x501   :  { %v1512_v41 = vsel %vm1510_vm4, %v1509_v39, %v1502_v40 }
 0x502   :  { %4126 = vmatmul.mubr.msk.f32.vlgmr.msra.gmra.mxu0 %vm72_vm0, %v1512_v41 }
 0x503   :  { %4140 = vmatpush3.msra.mxu0 %v1767_v61  ;;  %v3838_v61 = vld [vmem:[%s5125_s1 + $0x20] sm:$0xff] }
 0x504   :  { %4141 = vmatprep.subr.mxu0 %v1766_v62 }
 0x505   :  { %4142 = vmatpush3.msra.mxu0 %v1766_v62 }
 0x506   :  { %4143 = vmatprep.subr.mxu0 %v1765_v63 }
 0x507   :  { %4144 = vmatpush3.msra.mxu0 %v1765_v63 }
 0x508   :  { %4145 = vmatprep.subr.mxu0 %v1764_v0 }
 0x509   :  { %4146 = vmatpush3.msra.mxu0 %v1764_v0 }
 0x50a   :  { %4147 = vmatprep.subr.mxu0 %v1763_v32 }
 0x50b   :  { %4148 = vmatpush3.msra.mxu0 %v1763_v32 }
 0x50c   :  { %4149 = vmatprep.subr.mxu0 %v1762_v33 }
 0x50d   :  { %4150 = vmatpush3.msra.mxu0 %v1762_v33 }
 0x50e   :  { %4151 = vmatprep.subr.mxu0 %v1761_v34 }
 0x50f   :  { %4152 = vmatpush3.msra.mxu0 %v1761_v34 }
 0x510   :  { %4153 = vmatprep.subr.mxu0 %v1760_v35 }
 0x511   :  { %4154 = vmatpush3.msra.mxu0 %v1760_v35 }
 0x512   :  { %4179 = vmatprep.subr.mxu0 %v4446_v7 }
 0x5c2   :  { %v4127_v43 = vpop.f32.mrf.mxu0 }
 0x5c3   :  { %v1602_v44 = vadd.f32 %v4127_v43, %v3825_v42  ;;  %v3833_v43 = vld [vmem:[%s5134_s10] ss:$0 sm:$0xff] }
 0x5c4   :  { %v1596_v45 = vpop.f32.mrf.mxu0 }
 0x5c5   :  { %v1597_v46 = vadd.f32 %v3825_v42, %v1596_v45  ;;  %v1606_v47 = vadd.f32 %v1602_v44, %v4548_v5 }
 0x5c7   :  { %v1612_v48 = vsel %vm72_vm0, %v1606_v47, 0.0  ;;  %v1605_v49 = vadd.f32 %v1597_v46, %v4538_v2  ;;  %v1669_v2 = vld [vmem:[%s5131_s7 + $0x18] sm:$0xff] }
 0x5c8   :  { %1613 = vadd.xlane.f32.xlu1 %v1612_v48  ;;  %4128 = vmatprep.subr.mxu1 %v1669_v2 }
 0x5c9   :  { %v1609_v16 = vsel %vm72_vm0, %v1605_v49, 0.0  ;;  %4129 = vmatpush3.msra.mxu1 %v1669_v2 }
 0x5ca   :  { %1610 = vadd.xlane.f32.xlu0 %v1609_v16  ;;  %4130 = vmatprep.subr.mxu1 %v1668_v58 }
 0x5cb   :  { %4131 = vmatpush3.msra.mxu1 %v1668_v58  ;;  %v3841_v58 = vld [vmem:[%s5125_s1 + $0x38] sm:$0xff] }
 0x5cc   :  { %4132 = vmatprep.subr.mxu1 %v1667_v59 }
 0x5cd   :  { %4133 = vmatpush3.msra.mxu1 %v1667_v59  ;;  %v3840_v59 = vld [vmem:[%s5125_s1 + $0x30] sm:$0xff] }
 0x5ce   :  { %4134 = vmatprep.subr.mxu1 %v1666_v60 }
 0x5cf   :  { %4135 = vmatpush3.msra.mxu1 %v1666_v60  ;;  %v3839_v60 = vld [vmem:[%s5125_s1 + $0x28] sm:$0xff] }
 0x5d0   :  { %4158 = vmatprep.subr.mxu1 %v3841_v58 }
 0x651   :  { %v1614_v17 = vpop.xlane.xlu1 %1613 }
 0x652   :  { %v1617_v50 = vmul.f32 0.03125, %v1614_v17 }
 0x653   :  { %v1611_v51 = vpop.xlane.xlu0 %1610 }
 0x654   :  { %v1616_v52 = vmul.f32 0.03125, %v1611_v51  ;;  %v1619_v53 = vsub.f32 %v1606_v47, %v1617_v50 }
 0x656   :  { %v1618_v54 = vsub.f32 %v1605_v49, %v1616_v52  ;;  %v1621_v57 = vmul.f32 %v1619_v53, %v1619_v53  ;;  %v1651_v27 = vmul.f32 %v3828_v22, %v1619_v53 }
 0x658   :  { %v1620_v55 = vmul.f32 %v1618_v54, %v1618_v54  ;;  %v1625_v5 = vsel %vm72_vm0, %v1621_v57, 0.0  ;;  %v1650_v23 = vmul.f32 %v3828_v22, %v1618_v54 }
 0x65a   :  { %v1622_v56 = vsel %vm72_vm0, %v1620_v55, 0.0 }
 0x65b   :  { %1623 = vadd.xlane.f32.xlu0 %v1622_v56 }
 0x65f   :  { %1626 = vadd.xlane.f32.xlu0 %v1625_v5 }
 0x6e4   :  { %v1624_v1 = vpop.xlane.xlu0 %1623 }
 0x6e5   :  { %v1628_v3 = vmul.f32 0.03125, %v1624_v1 }
 0x6e7   :  { %4335 = vrsqrt.f32 %v1628_v3  ;;  %vm1632_vm5 = vcmp.eq.f32.partialorder %v1628_v3, inf  ;;  %v1635_v10 = vand.u32 2147483648, %v1628_v3  ;;  %vm1634_vm6 = vcmp.eq.f32.partialorder %v1628_v3, 0.0 }
 0x6e8   :  { %v1627_v4 = vpop.xlane.xlu0 %1626 }
 0x6e9   :  { %v1629_v6 = vmul.f32 0.03125, %v1627_v4 }
 0x6eb   :  { %4337 = vrsqrt.f32 %v1629_v6  ;;  %vm1639_vm7 = vcmp.eq.f32.partialorder %v1629_v6, inf  ;;  %v1642_v18 = vand.u32 2147483648, %v1629_v6  ;;  %vm1641_vm8 = vcmp.eq.f32.partialorder %v1629_v6, 0.0 }
 0x6f4   :  { %v4336_v8 = vpop.eup %4335 }
 0x6f5   :  { %v1631_v9 = vmul.f32 %v4336_v8, %v1628_v3 }
 0x6f7   :  { %v1633_v11 = vsel %vm1632_vm5, %v1628_v3, %v1631_v9 }
 0x6f8   :  { %v4338_v12 = vpop.eup %4337  ;;  %v1636_v13 = vsel %vm1634_vm6, %v1635_v10, %v1633_v11 }
 0x6f9   :  { %v1652_v14 = vadd.f32 1e-10, %v1636_v13  ;;  %v1638_v15 = vmul.f32 %v4338_v12, %v1629_v6 }
 0x6fb   :  { %4339 = vrcp.f32 %v1652_v14  ;;  %v1640_v19 = vsel %vm1639_vm7, %v1629_v6, %v1638_v15 }
 0x6fc   :  { %v1643_v20 = vsel %vm1641_vm8, %v1642_v18, %v1640_v19  ;;  %v3836_v19 = vld [vmem:[%s5135_s11] ss:$0 sm:$0xff] }
 0x6fd   :  { %v1653_v21 = vadd.f32 1e-10, %v1643_v20 }
 0x6ff   :  { %4341 = vrcp.f32 %v1653_v21 }
 0x708   :  { %v4340_v24 = vpop.eup %4339 }
 0x709   :  { %v1656_v26 = vmul.f32 %v4340_v24, %v1650_v23 }
 0x70b   :  { %v1664_v28 = vadd.f32 %v3829_v25, %v1656_v26 }
 0x70c   :  { %v4342_v29 = vpop.eup %4341 }
 0x70d   :  { %v1657_v30 = vmul.f32 %v4342_v29, %v1651_v27  ;;  %4136 = vmatprep.mubr.msk.f32.mxu1 %vm72_vm0, %v1664_v28  ;;  %v3843_v29 = vld [vmem:[%s5126_s2 + $0x1] ss:$0 sm:$0xff]  ;;  %s4455_s2 = smov [#allocation5]  }
 0x70f   :  { %v1665_v31 = vadd.f32 %v3829_v25, %v1657_v30  ;;  %v3837_v25 = vld [vmem:[%s5136_s12] ss:$0 sm:$0xff] }
 0x711   :  { %4137 = vmatmul.mubr.msk.f32.vlgmr.msra.gmra.mxu1 %vm72_vm0, %v1665_v31 }
 0x712   :  { %4159 = vmatpush3.msra.mxu1 %v3841_v58 }
 0x713   :  { %4160 = vmatprep.subr.mxu1 %v3840_v59 }
 0x714   :  { %4161 = vmatpush3.msra.mxu1 %v3840_v59 }
 0x715   :  { %4162 = vmatprep.subr.mxu1 %v3839_v60 }
 0x716   :  { %4163 = vmatpush3.msra.mxu1 %v3839_v60 }
 0x717   :  { %4164 = vmatprep.subr.mxu1 %v3838_v61 }
 0x718   :  { %4165 = vmatpush3.msra.mxu1 %v3838_v61 }
 0x719   :  { %4169 = vmatprep.subr.mxu1 %v4446_v7 }
 0x7d1   :  { %v4138_v37 = vpop.f32.mrf.mxu1 }
 0x7d2   :  { %v1755_v38 = vadd.f32 %v4138_v37, %v3830_v36 }
 0x7d3   :  { %v1749_v39 = vpop.f32.mrf.mxu1 }
 0x7d4   :  { %v1750_v40 = vadd.f32 %v3830_v36, %v1749_v39  ;;  %v1759_v42 = vmax.f32 %v1755_v38, 0.0 }
 0x7d6   :  { %v1758_v41 = vmax.f32 %v1750_v40, 0.0 }
 0x7d8   :  { %4155 = vmatprep.mubr.msk.f32.mxu0 %vm1775_vm9, %v1758_v41 }
 0x7d9   :  { %4156 = vmatmul.mubr.msk.f32.vlgmr.msra.gmra.mxu0 %vm1775_vm9, %v1759_v42 }
 0x7da   :  { %4181 = vmatprep.mubr.msk.f32.mxu0 %vm4449_vm1, %v4446_v7 }
 0x899   :  { %v4157_v44 = vpop.f32.mrf.mxu0 }
 0x89a   :  { %v1854_v45 = vadd.f32 %v4157_v44, %v3833_v43 }
 0x89b   :  { %v1848_v46 = vpop.f32.mrf.mxu0 }
 0x89c   :  { %v1849_v47 = vadd.f32 %v3833_v43, %v1848_v46  ;;  %v1858_v48 = vadd.f32 %v1854_v45, %v1665_v31 }
 0x89e   :  { %v1864_v49 = vsel %vm72_vm0, %v1858_v48, 0.0  ;;  %v1857_v16 = vadd.f32 %v1849_v47, %v1664_v28 }
 0x89f   :  { %1865 = vadd.xlane.f32.xlu0 %v1864_v49 }
 0x8a0   :  { %v1861_v17 = vsel %vm72_vm0, %v1857_v16, 0.0 }
 0x8a1   :  { %1862 = vadd.xlane.f32.xlu1 %v1861_v17 }
 0x928   :  { %v1866_v50 = vpop.xlane.xlu0 %1865 }
 0x929   :  { %v1868_v51 = vmul.f32 0.03125, %v1866_v50 }
 0x92a   :  { %v1863_v52 = vpop.xlane.xlu1 %1862 }
 0x92b   :  { %v1870_v53 = vsub.f32 %v1858_v48, %v1868_v51  ;;  %v1867_v54 = vmul.f32 0.03125, %v1863_v52 }
 0x92d   :  { %v1869_v55 = vsub.f32 %v1857_v16, %v1867_v54  ;;  %v1872_v56 = vmul.f32 %v1870_v53, %v1870_v53  ;;  %v1902_v21 = vmul.f32 %v3836_v19, %v1870_v53 }
 0x92f   :  { %v1876_v57 = vsel %vm72_vm0, %v1872_v56, 0.0  ;;  %v1871_v5 = vmul.f32 %v1869_v55, %v1869_v55  ;;  %v1901_v22 = vmul.f32 %v3836_v19, %v1869_v55 }
 0x930   :  { %1877 = vadd.xlane.f32.xlu0 %v1876_v57 }
 0x931   :  { %v1873_v2 = vsel %vm72_vm0, %v1871_v5, 0.0 }
 0x932   :  { %1874 = vadd.xlane.f32.xlu1 %v1873_v2 }
 0x9b9   :  { %v1878_v62 = vpop.xlane.xlu0 %1877 }
 0x9ba   :  { %v1880_v63 = vmul.f32 0.03125, %v1878_v62 }
 0x9bb   :  { %v1875_v0 = vpop.xlane.xlu1 %1874 }
 0x9bc   :  { %4343 = vrsqrt.f32 %v1880_v63  ;;  %v1879_v1 = vmul.f32 0.03125, %v1875_v0  ;;  %vm1890_vm10 = vcmp.eq.f32.partialorder %v1880_v63, inf  ;;  %v1893_v6 = vand.u32 2147483648, %v1880_v63 }
 0x9bd   :  { %vm1892_vm11 = vcmp.eq.f32.partialorder %v1880_v63, 0.0 }
 0x9be   :  { %4345 = vrsqrt.f32 %v1879_v1  ;;  %vm1883_vm12 = vcmp.eq.f32.partialorder %v1879_v1, inf  ;;  %v1886_v13 = vand.u32 2147483648, %v1879_v1  ;;  %vm1885_vm13 = vcmp.eq.f32.partialorder %v1879_v1, 0.0 }
 0x9c9   :  { %v4344_v3 = vpop.eup %4343 }
 0x9ca   :  { %v1889_v4 = vmul.f32 %v4344_v3, %v1880_v63 }
 0x9cb   :  { %v4346_v8 = vpop.eup %4345 }
 0x9cc   :  { %v1891_v9 = vsel %vm1890_vm10, %v1880_v63, %v1889_v4  ;;  %v1882_v11 = vmul.f32 %v4346_v8, %v1879_v1 }
 0x9cd   :  { %v1894_v10 = vsel %vm1892_vm11, %v1893_v6, %v1891_v9 }
 0x9ce   :  { %v1904_v12 = vadd.f32 1e-10, %v1894_v10  ;;  %v1884_v14 = vsel %vm1883_vm12, %v1879_v1, %v1882_v11 }
 0x9cf   :  { %v1887_v15 = vsel %vm1885_vm13, %v1886_v13, %v1884_v14 }
 0x9d0   :  { %4347 = vrcp.f32 %v1904_v12  ;;  %v1903_v18 = vadd.f32 1e-10, %v1887_v15 }
 0x9d2   :  { %4349 = vrcp.f32 %v1903_v18 }
 0x9dd   :  { %v4348_v20 = vpop.eup %4347 }
 0x9de   :  { %v1908_v24 = vmul.f32 %v4348_v20, %v1902_v21 }
 0x9df   :  { %v4350_v23 = vpop.eup %4349 }
 0x9e0   :  { %v1907_v26 = vmul.f32 %v4350_v23, %v1901_v22  ;;  %v4842_v28 = vadd.f32 %v3837_v25, %v1908_v24 }
 0x9e2   :  { %v4840_v27 = vadd.f32 %v3837_v25, %v1907_v26 }
 0x9e4   :  { %4166 = vmatprep.mubr.msk.f32.mxu1 %vm72_vm0, %v4840_v27 }
 0x9e5   :  { %4167 = vmatmul.mubr.msk.f32.vlgmr.msra.gmra.mxu1 %vm72_vm0, %v4842_v28 }
 0x9e6   :  { %4171 = vmatprep.mubr.msk.f32.mxu1 %vm4449_vm1, %v4446_v7 }
 0xaa5   :  { %v4168_v30 = vpop.f32.mrf.mxu1 }
 0xaa6   :  { %v4853_v31 = vadd.f32 %v4168_v30, %v3843_v29 }
 0xaa7   :  { %v2002_v32 = vpop.f32.mrf.mxu1 }
 0xaa8   :  { %v4855_v33 = vadd.f32 %v3843_v29, %v2002_v32  ;;  %2015 = vrot.lane.b32.xlu0 %v4853_v31, %s4448_s25 }
 0xaaa   :  { %2013 = vrot.lane.b32.xlu1 %v4855_v33, %s4448_s25 }
 0xaac   :  { %2021 = vrot.lane.b32.xlu0 %v4855_v33, %s4450_s26 }
 0xaae   :  { %2017 = vrot.lane.b32.xlu1 %v4855_v33, %s4447_s24 }
 0xab0   :  { %2025 = vrot.lane.b32.xlu0 %v4855_v33, %s4451_s27 }
 0xab2   :  { %2019 = vrot.lane.b32.xlu1 %v4853_v31, %s4447_s24  ;;  %s3786_s24 = sshll.u32 %s4455_s2, 4  ;;  %s3787_s24 = int_to_ptr.vmem [resolvable:$true] %s3786_s24 }
 0xab3   :  { %p4424_p6 = scmp.lt.s32.totalorder %s3787_s24, %s3787_s24 }
 0xab6   :  { %2023 = vrot.lane.b32.xlu1 %v4853_v31, %s4450_s26 }
 0xaba   :  { %2101 = vrot.lane.b32.xlu1 %v4853_v31, %s4451_s27 }
 0xb1a   :  { %v4873_v34 = vpop.permute.xlu0 %2015 }
 0xb1b   :  { %2253 = vrot.lane.b32.xlu1 %v4873_v34, %s4451_s27 }
 0xb1c   :  { %v4877_v35 = vpop.permute.xlu1 %2013 }
 0xb1d   :  { %2177 = vrot.lane.b32.xlu0 %v4877_v35, %s4451_s27 }
 0xb1e   :  { %v4881_v36 = vpop.permute.xlu0 %2021 }
 0xb20   :  { %v4883_v37 = vpop.permute.xlu1 %2017 }
 0xb21   :  { %2329 = vrot.lane.b32.xlu0 %v4883_v37, %s4451_s27 }
 0xb22   :  { %v2026_v38 = vpop.permute.xlu0 %2025 }
 0xb23   :  { %4170 = vmatpush3.xpose.msk.msra.mxu1 %vm170_vm2, %v2026_v38 }
 0xb24   :  { %v4888_v39 = vpop.permute.xlu1 %2019  ;;  %4174 = vmatprep.subr.mxu1 %v4446_v7 }
 0xb25   :  { %2481 = vrot.lane.b32.xlu0 %v4881_v36, %s4451_s27  ;;  %2405 = vrot.lane.b32.xlu1 %v4888_v39, %s4451_s27 }
 0xb26   :  { %4172 = vmatmul.mubr.msk.f32.vlgmr.msra.gmra.mxu1 %vm170_vm2, %v4855_v33 }
 0xb27   :  { %4176 = vmatprep.mubr.msk.f32.mxu1 %vm4449_vm1, %v4446_v7 }
 0xb28   :  { %v4899_v40 = vpop.permute.xlu1 %2023 }
 0xb29   :  { %2557 = vrot.lane.b32.xlu1 %v4899_v40, %s4451_s27 }
 0xb2c   :  { %v2102_v41 = vpop.permute.xlu1 %2101 }
 0xb2d   :  { %4175 = vmatpush3.xpose.msk.msra.mxu1 %vm170_vm2, %v2102_v41 }
 0xb2e   :  { %4184 = vmatprep.subr.mxu1 %v4446_v7 }
 0xb30   :  { %4177 = vmatmul.mubr.msk.f32.vlgmr.msra.gmra.mxu1 %vm170_vm2, %v4853_v31 }
 0xb31   :  { %4186 = vmatprep.mubr.msk.f32.mxu1 %vm4449_vm1, %v4446_v7 }
 0xb8d   :  { %v2254_v42 = vpop.permute.xlu1 %2253 }
 0xb8e   :  { %4185 = vmatpush3.xpose.msk.msra.mxu1 %vm170_vm2, %v2254_v42 }
 0xb8f   :  { %v2178_v43 = vpop.permute.xlu0 %2177  ;;  %4194 = vmatprep.subr.mxu1 %v4446_v7 }
 0xb90   :  { %4180 = vmatpush3.xpose.msk.msra.mxu0 %vm170_vm2, %v2178_v43 }
 0xb91   :  { %4187 = vmatmul.mubr.msk.f32.vlgmr.msra.gmra.mxu1 %vm170_vm2, %v4873_v34  ;;  %4189 = vmatprep.subr.mxu0 %v4446_v7 }
 0xb92   :  { %4196 = vmatprep.mubr.msk.f32.mxu1 %vm4449_vm1, %v4446_v7 }
 0xb93   :  { %4182 = vmatmul.mubr.msk.f32.vlgmr.msra.gmra.mxu0 %vm170_vm2, %v4877_v35  ;;  %v2330_v44 = vpop.permute.xlu0 %2329 }
 0xb94   :  { %4190 = vmatpush3.xpose.msk.msra.mxu0 %vm170_vm2, %v2330_v44  ;;  %4191 = vmatprep.mubr.msk.f32.mxu0 %vm4449_vm1, %v4446_v7 }
 0xb95   :  { %4199 = vmatprep.subr.mxu0 %v4446_v7 }
 0xb97   :  { %4192 = vmatmul.mubr.msk.f32.vlgmr.msra.gmra.mxu0 %vm170_vm2, %v4883_v37  ;;  %v2482_v45 = vpop.permute.xlu0 %2481  ;;  %v2406_v46 = vpop.permute.xlu1 %2405 }
 0xb98   :  { %4195 = vmatpush3.xpose.msk.msra.mxu1 %vm170_vm2, %v2406_v46  ;;  %4200 = vmatpush3.xpose.msk.msra.mxu0 %vm170_vm2, %v2482_v45 }
 0xb99   :  { %4201 = vmatprep.mubr.msk.f32.mxu0 %vm4449_vm1, %v4446_v7  ;;  %4204 = vmatprep.subr.mxu1 %v4446_v7 }
 0xb9a   :  { %4209 = vmatprep.subr.mxu0 %v4446_v7 }
 0xb9b   :  { %4197 = vmatmul.mubr.msk.f32.vlgmr.msra.gmra.mxu1 %vm170_vm2, %v4888_v39  ;;  %4202 = vmatmul.mubr.msk.f32.vlgmr.msra.gmra.mxu0 %vm170_vm2, %v4881_v36  ;;  %v2558_v47 = vpop.permute.xlu1 %2557 }
 0xb9c   :  { %4205 = vmatpush3.xpose.msk.msra.mxu1 %vm170_vm2, %v2558_v47  ;;  %4206 = vmatprep.mubr.msk.f32.mxu1 %vm4449_vm1, %v4446_v7 }
 0xb9d   :  { %4214 = vmatprep.subr.mxu1 %v4446_v7  ;;  %4211 = vmatprep.mubr.msk.f32.mxu0 %vm4449_vm1, %v4446_v7 }
 0xb9f   :  { %4207 = vmatmul.mubr.msk.f32.vlgmr.msra.gmra.mxu1 %vm170_vm2, %v4899_v40 }
 0xba0   :  { %4216 = vmatprep.mubr.msk.f32.mxu1 %vm4449_vm1, %v4446_v7 }
 0xbe6   :  { %v2097_v48 = vpop.f32.mrf.mxu1 }
 0xbe7   :  { %v2633_v49 = vmul.f32 0.35355338, %v2097_v48 }
 0xbe8   :  { %v4173_v16 = vpop.f32.mrf.mxu1 }
 0xbe9   :  { %v2641_v17 = vsel %vm170_vm2, %v2633_v49, -inf }
 0xbea   :  { %2642 = vmax.xlane.f32.xlu0 %v2641_v17 }
 0xbf0   :  { %v2173_v50 = vpop.f32.mrf.mxu1 }
 0xbf1   :  { %v2634_v51 = vmul.f32 0.35355338, %v2173_v50 }
 0xbf2   :  { %v4178_v52 = vpop.f32.mrf.mxu1 }
 0xbf3   :  { %v2644_v53 = vsel %vm170_vm2, %v2634_v51, -inf }
 0xbf4   :  { %2645 = vmax.xlane.f32.xlu1 %v2644_v53 }
 0xc51   :  { %v2325_v54 = vpop.f32.mrf.mxu1 }
 0xc52   :  { %v2636_v2 = vmul.f32 0.35355338, %v2325_v54 }
 0xc53   :  { %v2249_v55 = vpop.f32.mrf.mxu0  ;;  %v4188_v56 = vpop.f32.mrf.mxu1 }
 0xc54   :  { %v2635_v57 = vmul.f32 0.35355338, %v2249_v55  ;;  %v2650_v63 = vsel %vm170_vm2, %v2636_v2, -inf }
 0xc55   :  { %v4183_v5 = vpop.f32.mrf.mxu0 }
 0xc56   :  { %v2647_v58 = vsel %vm170_vm2, %v2635_v57, -inf }
 0xc57   :  { %2648 = vmax.xlane.f32.xlu0 %v2647_v58  ;;  %v2401_v59 = vpop.f32.mrf.mxu0 }
 0xc58   :  { %v2637_v60 = vmul.f32 0.35355338, %v2401_v59 }
 0xc59   :  { %v4193_v61 = vpop.f32.mrf.mxu0 }
 0xc5a   :  { %v2653_v62 = vsel %vm170_vm2, %v2637_v60, -inf }
 0xc5b   :  { %v2553_v0 = vpop.f32.mrf.mxu0  ;;  %2654 = vmax.xlane.f32.xlu1 %v2653_v62  ;;  %2651 = vmax.xlane.f32.xlu0 %v2650_v63  ;;  %v2477_v1 = vpop.f32.mrf.mxu1 }
 0xc5c   :  { %v2639_v3 = vmul.f32 0.35355338, %v2553_v0  ;;  %v2638_v4 = vmul.f32 0.35355338, %v2477_v1 }
 0xc5d   :  { %v4198_v6 = vpop.f32.mrf.mxu1  ;;  %v4203_v8 = vpop.f32.mrf.mxu0 }
 0xc5e   :  { %v2659_v9 = vsel %vm170_vm2, %v2639_v3, -inf  ;;  %v2656_v10 = vsel %vm170_vm2, %v2638_v4, -inf }
 0xc5f   :  { %2660 = vmax.xlane.f32.xlu1 %v2659_v9  ;;  %2657 = vmax.xlane.f32.xlu0 %v2656_v10  ;;  %v2629_v11 = vpop.f32.mrf.mxu1 }
 0xc60   :  { %v2640_v12 = vmul.f32 0.35355338, %v2629_v11 }
 0xc61   :  { %v4208_v13 = vpop.f32.mrf.mxu1 }
 0xc62   :  { %v2662_v14 = vsel %vm170_vm2, %v2640_v12, -inf }
 0xc63   :  { %2663 = vmax.xlane.f32.xlu0 %v2662_v14 }
 0xc70   :  { %2729 = vrot.lane.b32.xlu1 %v4855_v33, %s4452_s30 }
 0xc73   :  { %v2643_v19 = vpop.xlane.xlu0 %2642 }
 0xc74   :  { %2881 = vrot.lane.b32.xlu1 %v4877_v35, %s4452_s30  ;;  %v2665_v20 = vsub.f32 %v2633_v49, %v2643_v19 }
 0xc76   :  { %v2673_v22 = vmul.f32 1.442695, %v2665_v20 }
 0xc78   :  { %2957 = vrot.lane.b32.xlu1 %v4873_v34, %s4452_s30 }
 0xc79   :  { %2805 = vrot.lane.b32.xlu0 %v4853_v31, %s4452_s30 }
 0xc7c   :  { %3109 = vrot.lane.b32.xlu1 %v4888_v39, %s4452_s30 }
 0xc7d   :  { %3033 = vrot.lane.b32.xlu0 %v4883_v37, %s4452_s30  ;;  %v2646_v15 = vpop.xlane.xlu1 %2645 }
 0xc7e   :  { %v2666_v18 = vsub.f32 %v2634_v51, %v2646_v15 }
 0xc80   :  { %v2675_v21 = vmul.f32 1.442695, %v2666_v18 }
 0xc82   :  { %4351 = vpow2.f32 %v2675_v21 }
 0xc83   :  { %4353 = vpow2.f32 %v2673_v22 }
 0xc8f   :  { %v4965_v23 = vpop.eup %4351 }
 0xc90   :  { %v2692_v24 = vsel %vm170_vm2, %v4965_v23, 0.0  ;;  %v4969_v25 = vpop.eup %4353 }
 0xc91   :  { %v2689_v26 = vsel %vm170_vm2, %v4969_v25, 0.0 }
 0xc9c   :  { %2693 = vadd.xlane.f32.xlu0 %v2692_v24 }
 0xca0   :  { %2690 = vadd.xlane.f32.xlu1 %v2689_v26 }
 0xce0   :  { %v2649_v29 = vpop.xlane.xlu0 %2648 }
 0xce1   :  { %v2667_v30 = vsub.f32 %v2635_v57, %v2649_v29 }
 0xce3   :  { %v2677_v31 = vmul.f32 1.442695, %v2667_v30 }
 0xce4   :  { %v2652_v32 = vpop.xlane.xlu0 %2651  ;;  %v2655_v33 = vpop.xlane.xlu1 %2654 }
 0xce5   :  { %4355 = vpow2.f32 %v2677_v31  ;;  %v2668_v34 = vsub.f32 %v2636_v2, %v2652_v32  ;;  %v2669_v35 = vsub.f32 %v2637_v60, %v2655_v33 }
 0xce7   :  { %v2679_v37 = vmul.f32 1.442695, %v2668_v34  ;;  %v2681_v38 = vmul.f32 1.442695, %v2669_v35  ;;  %v3873_v34 = vld [vmem:[%s5127_s3 + $0x38] sm:$0xff]  ;;  %v3872_v35 = vld [vmem:[%s5127_s3 + $0x30] sm:$0xff] }
 0xce8   :  { %v2658_v39 = vpop.xlane.xlu0 %2657  ;;  %v2661_v41 = vpop.xlane.xlu1 %2660 }
 0xce9   :  { %4357 = vpow2.f32 %v2679_v37  ;;  %v2670_v42 = vsub.f32 %v2638_v4, %v2658_v39  ;;  %v2671_v43 = vsub.f32 %v2639_v3, %v2661_v41  ;;  %v3870_v37 = vld [vmem:[%s5127_s3 + $0x20] sm:$0xff] }
 0xcea   :  { %4359 = vpow2.f32 %v2681_v38 }
 0xceb   :  { %v2683_v44 = vmul.f32 1.442695, %v2670_v42  ;;  %v2685_v45 = vmul.f32 1.442695, %v2671_v43 }
 0xcec   :  { %v2664_v46 = vpop.xlane.xlu0 %2663  ;;  %v2730_v47 = vpop.permute.xlu1 %2729 }
 0xced   :  { %4361 = vpow2.f32 %v2683_v44  ;;  %v2672_v48 = vsub.f32 %v2640_v12, %v2664_v46  ;;  %4210 = vmatpush3.msra.mxu0 %v2730_v47 }
 0xcee   :  { %4363 = vpow2.f32 %v2685_v45  ;;  %4219 = vmatprep.subr.mxu0 %v4446_v7 }
 0xcef   :  { %v2687_v49 = vmul.f32 1.442695, %v2672_v48 }
 0xcf0   :  { %v2806_v16 = vpop.permute.xlu0 %2805  ;;  %v2882_v59 = vpop.permute.xlu1 %2881 }
 0xcf1   :  { %4365 = vpow2.f32 %v2687_v49  ;;  %4215 = vmatpush3.msra.mxu1 %v2806_v16 }
 0xcf2   :  { %v4356_v17 = vpop.eup %4355  ;;  %4224 = vmatprep.subr.mxu1 %v4446_v7 }
 0xcf3   :  { %v2695_v50 = vsel %vm170_vm2, %v4356_v17, 0.0 }
 0xcf4   :  { %2696 = vadd.xlane.f32.xlu1 %v2695_v50  ;;  %v2958_v60 = vpop.permute.xlu1 %2957  ;;  %v3034_v61 = vpop.permute.xlu0 %3033 }
 0xcf6   :  { %v4358_v51 = vpop.eup %4357 }
 0xcf7   :  { %v4360_v52 = vpop.eup %4359  ;;  %v2698_v53 = vsel %vm170_vm2, %v4358_v51, 0.0 }
 0xcf8   :  { %2699 = vadd.xlane.f32.xlu0 %v2698_v53  ;;  %v2701_v54 = vsel %vm170_vm2, %v4360_v52, 0.0  ;;  %v3110_v62 = vpop.permute.xlu1 %3109 }
 0xcf9   :  { %2702 = vadd.xlane.f32.xlu1 %v2701_v54 }
 0xcfa   :  { %v4362_v55 = vpop.eup %4361 }
 0xcfb   :  { %v4978_v56 = vpop.eup %4363  ;;  %v2704_v57 = vsel %vm170_vm2, %v4362_v55, 0.0 }
 0xcfc   :  { %2705 = vadd.xlane.f32.xlu0 %v2704_v57  ;;  %v2707_v5 = vsel %vm170_vm2, %v4978_v56, 0.0 }
 0xcfd   :  { %2708 = vadd.xlane.f32.xlu1 %v2707_v5 }
 0xcfe   :  { %v4983_v2 = vpop.eup %4365 }
 0xcff   :  { %v2710_v58 = vsel %vm170_vm2, %v4983_v2, 0.0 }
 0xd00   :  { %2711 = vadd.xlane.f32.xlu0 %v2710_v58 }
 0xd0e   :  { %3261 = vrot.lane.b32.xlu1 %v4899_v40, %s4452_s30 }
 0xd16   :  { %3185 = vrot.lane.b32.xlu0 %v4881_v36, %s4452_s30 }
 0xd25   :  { %v2694_v63 = vpop.xlane.xlu0 %2693 }
 0xd26   :  { %4367 = vrcp.f32 %v2694_v63 }
 0xd29   :  { %v2691_v0 = vpop.xlane.xlu1 %2690 }
 0xd2a   :  { %4369 = vrcp.f32 %v2691_v0 }
 0xd33   :  { %v4368_v1 = vpop.eup %4367 }
 0xd34   :  { %v2722_v3 = vmul.f32 %v4368_v1, %v4965_v23 }
 0xd36   :  { %4217 = vmatmul.mubr.msk.f32.vlgmr.msra.gmra.mxu1 %vm170_vm2, %v2722_v3 }
 0xd37   :  { %v4370_v4 = vpop.eup %4369  ;;  %4225 = vmatpush3.msra.mxu1 %v2958_v60  ;;  %4226 = vmatprep.mubr.msk.f32.mxu1 %vm4449_vm1, %v4446_v7 }
 0xd38   :  { %v2721_v36 = vmul.f32 %v4370_v4, %v4969_v25  ;;  %4234 = vmatprep.subr.mxu1 %v4446_v7 }
 0xd3a   :  { %4212 = vmatmul.mubr.msk.f32.vlgmr.msra.gmra.mxu0 %vm170_vm2, %v2721_v36 }
 0xd3b   :  { %4220 = vmatpush3.msra.mxu0 %v2882_v59  ;;  %4221 = vmatprep.mubr.msk.f32.mxu0 %vm4449_vm1, %v4446_v7  ;;  %v3875_v59 = vld [vmem:[%s5128_s4 + $0x1] ss:$0 sm:$0xff] }
 0xd3c   :  { %4229 = vmatprep.subr.mxu0 %v4446_v7 }
 0xd7d   :  { %v2697_v40 = vpop.xlane.xlu1 %2696 }
 0xd7e   :  { %4371 = vrcp.f32 %v2697_v40 }
 0xd81   :  { %v2700_v6 = vpop.xlane.xlu0 %2699 }
 0xd82   :  { %4373 = vrcp.f32 %v2700_v6  ;;  %v2703_v8 = vpop.xlane.xlu1 %2702 }
 0xd83   :  { %4375 = vrcp.f32 %v2703_v8 }
 0xd85   :  { %v2706_v9 = vpop.xlane.xlu0 %2705 }
 0xd86   :  { %4377 = vrcp.f32 %v2706_v9  ;;  %v2709_v10 = vpop.xlane.xlu1 %2708 }
 0xd87   :  { %4379 = vrcp.f32 %v2709_v10 }
 0xd89   :  { %v2712_v11 = vpop.xlane.xlu0 %2711 }
 0xd8a   :  { %4381 = vrcp.f32 %v2712_v11  ;;  %v3262_v25 = vpop.permute.xlu1 %3261 }
 0xd8b   :  { %v4372_v12 = vpop.eup %4371 }
 0xd8c   :  { %v2723_v13 = vmul.f32 %v4372_v12, %v4356_v17 }
 0xd8d   :  { %v3186_v21 = vpop.permute.xlu0 %3185 }
 0xd8e   :  { %4222 = vmatmul.mubr.msk.f32.vlgmr.msra.gmra.mxu0 %vm170_vm2, %v2723_v13 }
 0xd8f   :  { %v4374_v14 = vpop.eup %4373  ;;  %4230 = vmatpush3.msra.mxu0 %v3034_v61  ;;  %4231 = vmatprep.mubr.msk.f32.mxu0 %vm4449_vm1, %v4446_v7 }
 0xd90   :  { %v4376_v15 = vpop.eup %4375  ;;  %4239 = vmatprep.subr.mxu0 %v4446_v7  ;;  %v2724_v18 = vmul.f32 %v4374_v14, %v4358_v51  ;;  %v3884_v14 = vld [vmem:[%s5131_s7 + $0x30] sm:$0xff] }
 0xd91   :  { %v2725_v19 = vmul.f32 %v4376_v15, %v4360_v52  ;;  %v3883_v15 = vld [vmem:[%s5131_s7 + $0x28] sm:$0xff] }
 0xd92   :  { %4227 = vmatmul.mubr.msk.f32.vlgmr.msra.gmra.mxu1 %vm170_vm2, %v2724_v18  ;;  %v3882_v18 = vld [vmem:[%s5131_s7 + $0x20] sm:$0xff] }
 0xd93   :  { %v4378_v20 = vpop.eup %4377  ;;  %4232 = vmatmul.mubr.msk.f32.vlgmr.msra.gmra.mxu0 %vm170_vm2, %v2725_v19  ;;  %4235 = vmatpush3.msra.mxu1 %v3110_v62  ;;  %v3897_v19 = vld [vmem:[%s5133_s9 + $0x78] sm:$0xff] }
 0xd94   :  { %v4380_v22 = vpop.eup %4379  ;;  %4240 = vmatpush3.msra.mxu0 %v3186_v21  ;;  %4236 = vmatprep.mubr.msk.f32.mxu1 %vm4449_vm1, %v4446_v7  ;;  %v2726_v23 = vmul.f32 %v4378_v20, %v4362_v55  ;;  %v3896_v20 = vld [vmem:[%s5133_s9 + $0x70] sm:$0xff]  ;;  %v3895_v21 = vld [vmem:[%s5133_s9 + $0x68] sm:$0xff] }
 0xd95   :  { %4241 = vmatprep.mubr.msk.f32.mxu0 %vm4449_vm1, %v4446_v7  ;;  %4244 = vmatprep.subr.mxu1 %v4446_v7  ;;  %v2727_v24 = vmul.f32 %v4380_v22, %v4978_v56  ;;  %v3894_v22 = vld [vmem:[%s5133_s9 + $0x60] sm:$0xff] }
 0xd96   :  { %4237 = vmatmul.mubr.msk.f32.vlgmr.msra.gmra.mxu1 %vm170_vm2, %v2726_v23  ;;  %4249 = vmatprep.subr.mxu0 %v3873_v34 }
 0xd97   :  { %v4382_v26 = vpop.eup %4381  ;;  %4242 = vmatmul.mubr.msk.f32.vlgmr.msra.gmra.mxu0 %vm170_vm2, %v2727_v24  ;;  %4245 = vmatpush3.msra.mxu1 %v3262_v25 }
 0xd98   :  { %4246 = vmatprep.mubr.msk.f32.mxu1 %vm4449_vm1, %v4446_v7  ;;  %v2728_v29 = vmul.f32 %v4382_v26, %v4983_v2  ;;  %4250 = vmatpush3.msra.mxu0 %v3873_v34  ;;  %v3871_v7 = vld [vmem:[%s5127_s3 + $0x28] sm:$0xff] }
 0xd99   :  { %4251 = vmatprep.subr.mxu0 %v3872_v35 }
 0xd9a   :  { %4247 = vmatmul.mubr.msk.f32.vlgmr.msra.gmra.mxu1 %vm170_vm2, %v2728_v29  ;;  %4252 = vmatpush3.msra.mxu0 %v3872_v35 }
 0xd9b   :  { %4253 = vmatprep.subr.mxu0 %v3871_v7 }
 0xd9c   :  { %4254 = vmatpush3.msra.mxu0 %v3871_v7 }
 0xd9d   :  { %4255 = vmatprep.subr.mxu0 %v3870_v37 }
 0xd9e   :  { %4256 = vmatpush3.msra.mxu0 %v3870_v37 }
 0xd9f   :  { %4271 = vmatprep.subr.mxu0 %v3897_v19 }
 0xdf6   :  { %v2877_v30 = vpop.f32.mrf.mxu1 }
 0xdf8   :  { %v4218_v31 = vpop.f32.mrf.mxu1 }
 0xdfa   :  { %v2801_v32 = vpop.f32.mrf.mxu0 }
 0xdfc   :  { %v4213_v33 = vpop.f32.mrf.mxu0 }
 0xe4e   :  { %v2953_v38 = vpop.f32.mrf.mxu0 }
 0xe4f   :  { %3339 = vrot.lane.b32.xlu0 %v2953_v38, %s4445_s29 }
 0xe50   :  { %v4223_v39 = vpop.f32.mrf.mxu0 }
 0xe52   :  { %v3029_v41 = vpop.f32.mrf.mxu1 }
 0xe53   :  { %v3105_v42 = vpop.f32.mrf.mxu0  ;;  %3341 = vrot.lane.b32.xlu1 %v3029_v41, %s4445_s29 }
 0xe54   :  { %3347 = vrot.lane.b32.xlu0 %v3105_v42, %s4453_s21  ;;  %v4228_v43 = vpop.f32.mrf.mxu1  ;;  %v3880_v42 = vld [vmem:[%s5129_s5 + $0x1] ss:$0 sm:$0xff] }
 0xe55   :  { %v4233_v44 = vpop.f32.mrf.mxu0 }
 0xe56   :  { %v3181_v45 = vpop.f32.mrf.mxu1 }
 0xe57   :  { %v3257_v46 = vpop.f32.mrf.mxu0  ;;  %3349 = vrot.lane.b32.xlu1 %v3181_v45, %s4453_s21  ;;  %v3881_v45 = vld [vmem:[%s5130_s6 + $0x1] ss:$0 sm:$0xff] }
 0xe58   :  { %3355 = vrot.lane.b32.xlu0 %v3257_v46, %s4454_s22  ;;  %v4238_v47 = vpop.f32.mrf.mxu1 }
 0xe59   :  { %v4243_v48 = vpop.f32.mrf.mxu0 }
 0xe5a   :  { %v3333_v49 = vpop.f32.mrf.mxu1 }
 0xe5b   :  { %3357 = vrot.lane.b32.xlu1 %v3333_v49, %s4454_s22 }
 0xe5c   :  { %v4248_v16 = vpop.f32.mrf.mxu1 }
 0xec1   :  { %v3340_v17 = vpop.permute.xlu0 %3339 }
 0xec2   :  { %v3361_v52 = vsel %vm170_vm2, %v2801_v32, %v3340_v17 }
 0xec5   :  { %v3342_v50 = vpop.permute.xlu1 %3341 }
 0xec6   :  { %v3348_v51 = vpop.permute.xlu0 %3347  ;;  %v3362_v57 = vsel %vm170_vm2, %v2877_v30, %v3342_v50  ;;  %v3893_v50 = vld [vmem:[%s5133_s9 + $0x58] sm:$0xff] }
 0xec7   :  { %v3363_v54 = vsel %vm1507_vm3, %v3361_v52, %v3348_v51  ;;  %v3892_v51 = vld [vmem:[%s5133_s9 + $0x50] sm:$0xff]  ;;  %v3891_v52 = vld [vmem:[%s5133_s9 + $0x48] sm:$0xff] }
 0xec9   :  { %v3350_v53 = vpop.permute.xlu1 %3349 }
 0xeca   :  { %v3356_v55 = vpop.permute.xlu0 %3355  ;;  %v3364_v5 = vsel %vm1507_vm3, %v3362_v57, %v3350_v53  ;;  %v3890_v53 = vld [vmem:[%s5133_s9 + $0x40] sm:$0xff] }
 0xecb   :  { %v3365_v56 = vsel %vm1510_vm4, %v3363_v54, %v3356_v55  ;;  %v3887_v54 = vld [vmem:[%s5132_s8 + $0x1] ss:$0 sm:$0xff] }
 0xecc   :  { %4257 = vmatprep.mubr.msk.f32.mxu0 %vm72_vm0, %v3365_v56 }
 0xecd   :  { %v3358_v2 = vpop.permute.xlu1 %3357 }
 0xece   :  { %v3366_v58 = vsel %vm1510_vm4, %v3364_v5, %v3358_v2 }
 0xecf   :  { %4258 = vmatmul.mubr.msk.f32.vlgmr.msra.gmra.mxu0 %vm72_vm0, %v3366_v58 }
 0xed0   :  { %4272 = vmatpush3.msra.mxu0 %v3897_v19 }
 0xed1   :  { %4273 = vmatprep.subr.mxu0 %v3896_v20 }
 0xed2   :  { %4274 = vmatpush3.msra.mxu0 %v3896_v20 }
 0xed3   :  { %4275 = vmatprep.subr.mxu0 %v3895_v21 }
 0xed4   :  { %4276 = vmatpush3.msra.mxu0 %v3895_v21 }
 0xed5   :  { %4277 = vmatprep.subr.mxu0 %v3894_v22 }
 0xed6   :  { %4278 = vmatpush3.msra.mxu0 %v3894_v22 }
 0xed7   :  { %4279 = vmatprep.subr.mxu0 %v3893_v50 }
 0xed8   :  { %4280 = vmatpush3.msra.mxu0 %v3893_v50 }
 0xed9   :  { %4281 = vmatprep.subr.mxu0 %v3892_v51 }
 0xeda   :  { %4282 = vmatpush3.msra.mxu0 %v3892_v51 }
 0xedb   :  { %4283 = vmatprep.subr.mxu0 %v3891_v52 }
 0xedc   :  { %4284 = vmatpush3.msra.mxu0 %v3891_v52 }
 0xedd   :  { %4285 = vmatprep.subr.mxu0 %v3890_v53 }
 0xede   :  { %4286 = vmatpush3.msra.mxu0 %v3890_v53 }
 0xf8f   :  { %v4259_v60 = vpop.f32.mrf.mxu0 }
 0xf90   :  { %v3458_v61 = vadd.f32 %v4259_v60, %v3875_v59 }
 0xf91   :  { %v3452_v62 = vpop.f32.mrf.mxu0 }
 0xf92   :  { %v3453_v63 = vadd.f32 %v3875_v59, %v3452_v62  ;;  %v3462_v0 = vadd.f32 %v3458_v61, %v4842_v28  ;;  %v3899_v59 = vld [vmem:[%s5134_s10 + $0x1] ss:$0 sm:$0xff] }
 0xf94   :  { %v3470_v1 = vsel %vm72_vm0, %v3462_v0, 0.0  ;;  %v3461_v3 = vadd.f32 %v3453_v63, %v4840_v27  ;;  %v3885_v27 = vld [vmem:[%s5131_s7 + $0x38] sm:$0xff] }
 0xf95   :  { %3471 = vadd.xlane.f32.xlu1 %v3470_v1  ;;  %4260 = vmatprep.subr.mxu1 %v3885_v27 }
 0xf96   :  { %v3467_v4 = vsel %vm72_vm0, %v3461_v3, 0.0  ;;  %4261 = vmatpush3.msra.mxu1 %v3885_v27 }
 0xf97   :  { %3468 = vadd.xlane.f32.xlu0 %v3467_v4  ;;  %4262 = vmatprep.subr.mxu1 %v3884_v14 }
 0xf98   :  { %4263 = vmatpush3.msra.mxu1 %v3884_v14 }
 0xf99   :  { %4264 = vmatprep.subr.mxu1 %v3883_v15 }
 0xf9a   :  { %4265 = vmatpush3.msra.mxu1 %v3883_v15 }
 0xf9b   :  { %4266 = vmatprep.subr.mxu1 %v3882_v18 }
 0xf9c   :  { %4267 = vmatpush3.msra.mxu1 %v3882_v18 }
0x101e   :  { %v3472_v36 = vpop.xlane.xlu1 %3471 }
0x101f   :  { %v3474_v40 = vmul.f32 0.03125, %v3472_v36 }
0x1020   :  { %v3469_v6 = vpop.xlane.xlu0 %3468 }
0x1021   :  { %v3473_v8 = vmul.f32 0.03125, %v3469_v6  ;;  %v3476_v9 = vsub.f32 %v3462_v0, %v3474_v40 }
0x1023   :  { %v3475_v10 = vsub.f32 %v3461_v3, %v3473_v8  ;;  %v3478_v13 = vmul.f32 %v3476_v9, %v3476_v9  ;;  %v3508_v47 = vmul.f32 %v3880_v42, %v3476_v9 }
0x1025   :  { %v3477_v11 = vmul.f32 %v3475_v10, %v3475_v10  ;;  %v3482_v28 = vsel %vm72_vm0, %v3478_v13, 0.0  ;;  %v3507_v43 = vmul.f32 %v3880_v42, %v3475_v10 }
0x1027   :  { %v3479_v12 = vsel %vm72_vm0, %v3477_v11, 0.0 }
0x1028   :  { %3480 = vadd.xlane.f32.xlu0 %v3479_v12 }
0x102c   :  { %3483 = vadd.xlane.f32.xlu0 %v3482_v28 }
0x10b1   :  { %v3481_v23 = vpop.xlane.xlu0 %3480 }
0x10b2   :  { %v3485_v24 = vmul.f32 0.03125, %v3481_v23 }
0x10b4   :  { %4383 = vrsqrt.f32 %v3485_v24  ;;  %vm3489_vm14 = vcmp.eq.f32.partialorder %v3485_v24, inf  ;;  %v3492_v31 = vand.u32 2147483648, %v3485_v24  ;;  %vm3491_vm15 = vcmp.eq.f32.partialorder %v3485_v24, 0.0 }
0x10b5   :  { %v3484_v25 = vpop.xlane.xlu0 %3483 }
0x10b6   :  { %v3486_v26 = vmul.f32 0.03125, %v3484_v25 }
0x10b8   :  { %4385 = vrsqrt.f32 %v3486_v26  ;;  %vm3496_vm1 = vcmp.eq.f32.partialorder %v3486_v26, inf  ;;  %v3499_v37 = vand.u32 2147483648, %v3486_v26  ;;  %vm3498_vm2 = vcmp.eq.f32.partialorder %v3486_v26, 0.0 }
0x10c1   :  { %v4384_v29 = vpop.eup %4383 }
0x10c2   :  { %v3488_v30 = vmul.f32 %v4384_v29, %v3485_v24 }
0x10c4   :  { %v3490_v32 = vsel %vm3489_vm14, %v3485_v24, %v3488_v30 }
0x10c5   :  { %v4386_v33 = vpop.eup %4385  ;;  %v3493_v34 = vsel %vm3491_vm15, %v3492_v31, %v3490_v32 }
0x10c6   :  { %v3509_v35 = vadd.f32 1e-10, %v3493_v34  ;;  %v3495_v7 = vmul.f32 %v4386_v33, %v3486_v26  ;;  %v3904_v33 = vld [vmem:[%s5135_s11 + $0x1] ss:$0 sm:$0xff]  ;;  %s4419_s11 = scalar_lea.vmem %s3787_s24, 256 }
0x10c7   :  { %p4420_p5 = scmp.ne.s32.totalorder %s3787_s24, %s4419_s11  ;;  %p4425_p7 = scmp.lt.s32.totalorder %s4419_s11, %s4419_s11 }
0x10c8   :  { %4387 = vrcp.f32 %v3509_v35  ;;  %v3497_v38 = vsel %vm3496_vm1, %v3486_v26, %v3495_v7  ;;  %v3905_v7 = vld [vmem:[%s5136_s12 + $0x1] ss:$0 sm:$0xff] }
0x10c9   :  { %v3500_v39 = vsel %vm3498_vm2, %v3499_v37, %v3497_v38  ;;  %p4426_p8 = por %p4425_p7, %p4424_p6 }
0x10ca   :  { %v3510_v41 = vadd.f32 1e-10, %v3500_v39 }
0x10cb   :  { %p4427_p9 = pnand %p4426_p8, %p4420_p5 }
0x10cc   :  { %4389 = vrcp.f32 %v3510_v41 }
0x10d5   :  { %v4388_v44 = vpop.eup %4387 }
0x10d6   :  { %v3513_v46 = vmul.f32 %v4388_v44, %v3507_v43 }
0x10d8   :  { %v3521_v48 = vadd.f32 %v3881_v45, %v3513_v46 }
0x10d9   :  { %v4390_v49 = vpop.eup %4389 }
0x10da   :  { %v3514_v16 = vmul.f32 %v4390_v49, %v3508_v47  ;;  %4268 = vmatprep.mubr.msk.f32.mxu1 %vm72_vm0, %v3521_v48 }
0x10dc   :  { %v3522_v17 = vadd.f32 %v3881_v45, %v3514_v16 }
0x10de   :  { %4269 = vmatmul.mubr.msk.f32.vlgmr.msra.gmra.mxu1 %vm72_vm0, %v3522_v17 }
0x119e   :  { %v4270_v55 = vpop.f32.mrf.mxu1 }
0x119f   :  { %v3614_v56 = vadd.f32 %v4270_v55, %v3887_v54 }
0x11a0   :  { %v3608_v57 = vpop.f32.mrf.mxu1 }
0x11a1   :  { %v3609_v5 = vadd.f32 %v3887_v54, %v3608_v57  ;;  %v3618_v58 = vmax.f32 %v3614_v56, 0.0 }
0x11a3   :  { %v3617_v2 = vmax.f32 %v3609_v5, 0.0 }
0x11a5   :  { %4287 = vmatprep.mubr.msk.f32.mxu0 %vm1775_vm9, %v3617_v2 }
0x11a6   :  { %4288 = vmatmul.mubr.msk.f32.vlgmr.msra.gmra.mxu0 %vm1775_vm9, %v3618_v58 }
0x1266   :  { %v4289_v60 = vpop.f32.mrf.mxu0 }
0x1267   :  { %v3714_v61 = vadd.f32 %v4289_v60, %v3899_v59 }
0x1268   :  { %v3708_v62 = vpop.f32.mrf.mxu0 }
0x1269   :  { %v3718_v63 = vadd.f32 %v3714_v61, %v3522_v17  ;;  %v3709_v0 = vadd.f32 %v3899_v59, %v3708_v62 }
0x126b   :  { %v3717_v1 = vadd.f32 %v3709_v0, %v3521_v48  ;;  %v3726_v3 = vsel %vm72_vm0, %v3718_v63, 0.0 }
0x126c   :  { %3727 = vadd.xlane.f32.xlu0 %v3726_v3 }
0x126d   :  { %v3723_v4 = vsel %vm72_vm0, %v3717_v1, 0.0 }
0x126e   :  { %3724 = vadd.xlane.f32.xlu1 %v3723_v4 }
0x12f5   :  { %v3728_v36 = vpop.xlane.xlu0 %3727 }
0x12f6   :  { %v3730_v40 = vmul.f32 0.03125, %v3728_v36 }
0x12f7   :  { %v3725_v6 = vpop.xlane.xlu1 %3724 }
0x12f8   :  { %v3732_v8 = vsub.f32 %v3718_v63, %v3730_v40  ;;  %v3729_v9 = vmul.f32 0.03125, %v3725_v6 }
0x12fa   :  { %v3731_v10 = vsub.f32 %v3717_v1, %v3729_v9  ;;  %v3734_v11 = vmul.f32 %v3732_v8, %v3732_v8  ;;  %v3764_v34 = vmul.f32 %v3904_v33, %v3732_v8 }
0x12fc   :  { %v3738_v12 = vsel %vm72_vm0, %v3734_v11, 0.0  ;;  %v3733_v13 = vmul.f32 %v3731_v10, %v3731_v10  ;;  %v3763_v38 = vmul.f32 %v3904_v33, %v3731_v10 }
0x12fd   :  { %3739 = vadd.xlane.f32.xlu0 %v3738_v12 }
0x12fe   :  { %v3735_v28 = vsel %vm72_vm0, %v3733_v13, 0.0 }
0x12ff   :  { %3736 = vadd.xlane.f32.xlu1 %v3735_v28 }
0x1386   :  { %v3740_v27 = vpop.xlane.xlu0 %3739 }
0x1387   :  { %v3742_v14 = vmul.f32 0.03125, %v3740_v27 }
0x1388   :  { %v3737_v15 = vpop.xlane.xlu1 %3736 }
0x1389   :  { %4391 = vrsqrt.f32 %v3742_v14  ;;  %v3741_v18 = vmul.f32 0.03125, %v3737_v15  ;;  %vm3752_vm3 = vcmp.eq.f32.partialorder %v3742_v14, inf  ;;  %v3755_v21 = vand.u32 2147483648, %v3742_v14 }
0x138a   :  { %vm3754_vm4 = vcmp.eq.f32.partialorder %v3742_v14, 0.0 }
0x138b   :  { %4393 = vrsqrt.f32 %v3741_v18  ;;  %vm3745_vm5 = vcmp.eq.f32.partialorder %v3741_v18, inf  ;;  %v3748_v29 = vand.u32 2147483648, %v3741_v18  ;;  %vm3747_vm6 = vcmp.eq.f32.partialorder %v3741_v18, 0.0 }
0x1396   :  { %v4392_v19 = vpop.eup %4391 }
0x1397   :  { %v3751_v20 = vmul.f32 %v4392_v19, %v3742_v14 }
0x1398   :  { %v4394_v22 = vpop.eup %4393 }
0x1399   :  { %v3753_v23 = vsel %vm3752_vm3, %v3742_v14, %v3751_v20  ;;  %v3744_v25 = vmul.f32 %v4394_v22, %v3741_v18 }
0x139a   :  { %v3756_v24 = vsel %vm3754_vm4, %v3755_v21, %v3753_v23 }
0x139b   :  { %v3766_v26 = vadd.f32 1e-10, %v3756_v24  ;;  %v3746_v30 = vsel %vm3745_vm5, %v3741_v18, %v3744_v25 }
0x139c   :  { %v3749_v31 = vsel %vm3747_vm6, %v3748_v29, %v3746_v30 }
0x139d   :  { %4395 = vrcp.f32 %v3766_v26  ;;  %v3765_v32 = vadd.f32 1e-10, %v3749_v31 }
0x139f   :  { %4397 = vrcp.f32 %v3765_v32 }
0x13aa   :  { %v4396_v35 = vpop.eup %4395 }
0x13ab   :  { %v3770_v37 = vmul.f32 %v4396_v35, %v3764_v34 }
0x13ac   :  { %v4398_v39 = vpop.eup %4397 }
0x13ad   :  { %v3778_v41 = vadd.f32 %v3905_v7, %v3770_v37  ;;  %v3769_v42 = vmul.f32 %v4398_v39, %v3763_v38 }
0x13af   :  { %3780 = vst.msk [vmem:[#allocation5 + $0x8] sm:$0xff] %vm72_vm0, %v3778_v41  ;;  %v3777_v43 = vadd.f32 %v3905_v7, %v3769_v42 }
0x13b1   :  { %3779 = vst.msk [vmem:[#allocation5] sm:$0xff] %vm72_vm0, %v3777_v43 }
0x13b2   :  { %4430 = shalt.err (!%p4427_p9)
}
0x13b3   :  { %3792 = dma.vmem_to_hbm [thread:$0]  %s3787_s24, 256, %s5137_s13, [#allocation4], %s4444_s28, %s4444_s28, %s4445_s29  }
0x13b4   :  { %4441 = dma.done.wait [#allocation4], 256  }
0x13b5   :  { %4442 = vsyncadd [#allocation4], 4294967040 }
0x13b6   :  { %3796 = vsyncpa [#allocation3], 1 }
0x13b7   :  { %3797 = vsyncpa [#allocation4], 1 }

</bundles_post_ra>
